<compile_context>
chip_gen: v7x
topology: tpu7x:2x2x1
jax: 0.10.0
libtpu: 0.0.40
codegen_flags: <defaults>
</compile_context>

<pallas_src>
import math

import jax
import jax.numpy as jnp
import numpy as np
from jax.experimental import pallas as pl
from jax.experimental.pallas import tpu as pltpu

BASE_SIZE = 4                          # LSTM input feature size (I)
HIDDEN_DIM = 32                        # params.hidden_dim (H)
LATENT_DIMS = 16                       # params.latent_dims (Z)
N_LAYERS = 1                           # params.n_layers (must be 1, see TODO)
FC_DIM = 512                           # linear1 output width
SEQ_LEN = 8                            # L (must equal ROWS for h_n reshape)
ROWS = 8                               # N (LSTM batch rows per timestep)
I_AUG = 8                              # padded input features: [x(4) | 0(3) | 1(1)]
OUT_W = 2 * LATENT_DIMS + HIDDEN_DIM   # 64: output slab cols [mu | log_var | h_t]


# ----------------------------------------------------------------------------
# Fused kernel: LSTM recurrence + interleaved linear1/ReLU + [linear2 | linear3]
# One encoder instance per grid step; grid axis is "parallel".
# ----------------------------------------------------------------------------
def _encoder_kernel(x_ref, lstm_ref, fc1_ref, fc23_ref, out_ref):
    """Per-grid-step refs:
      x_ref   : (L*R, I_AUG)   cols = [x(4) | zeros(3) | ones(1)]
      lstm_ref: (I_AUG+H, 4H)  rows [0:4]=W_ih^T, [7]=b_ih+b_hh, [8:40]=W_hh^T
                (g-gate columns pre-scaled by 2 for the tanh-via-sigmoid trick)
      fc1_ref : (H+R, 512)     rows [0:32]=W1^T, [32:40]=b1 replicated
      fc23_ref: (512+R, 2Z)    rows [0:512]=[W2^T|W3^T], [512:520]=[b2|b3] replicated
      out_ref : (L*R, OUT_W)   cols [0:Z]=mu, [Z:2Z]=log_var, [2Z:2Z+H]=h_t
    """
    H, Z2, R = HIDDEN_DIM, 2 * LATENT_DIMS, ROWS
    LN, _ = x_ref.shape
    L = LN // R

    # Hoisted input projection for ALL timesteps at once; the LSTM bias rides in
    # via the ones-column of x_aug (row I_AUG-1 of lstm_pack) — no bias add.
    gates_x = jnp.dot(x_ref[...], lstm_ref[0:I_AUG, :],
                      preferred_element_type=jnp.float32)           # (L*R, 4H)
    whh = lstm_ref[I_AUG:I_AUG + H, :]                               # (H, 4H)
    b1 = fc1_ref[H:H + R, :]                                         # (R, 512)
    b23 = fc23_ref[FC_DIM:FC_DIM + R, :]                             # (R, 2Z)

    h = jnp.zeros((R, H), jnp.float32)
    c = jnp.zeros((R, H), jnp.float32)
    for t in range(L):                 # fully unrolled: L is a small static constant
        # PyTorch gate order [i, f, g, o]; g columns are pre-doubled.
        gates = gates_x[t * R:(t + 1) * R, :] + jnp.dot(
            h, whh, preferred_element_type=jnp.float32)              # (R, 4H)
        sg = jax.nn.sigmoid(gates)          # ONE EUP pass over all four gates
        i_g = sg[:, 0:H]
        f_g = sg[:, H:2 * H]
        g_g = 2.0 * sg[:, 2 * H:3 * H] - 1.0   # tanh(g) = 2*sigmoid(2g)-1 (VALU only)
        o_g = sg[:, 3 * H:4 * H]
        c = f_g * c + i_g * g_g
        h = o_g * jnp.tanh(c)               # second (and last) EUP pass of this step

        # MLP head interleaved into the recurrence: the MXU is idle while the serial
        # EUP->VALU chain runs, so linear1/linear2/linear3 hide under it and the
        # hidden_outputs never need a VMEM scratch round-trip.
        z_t = jnp.maximum(
            jnp.dot(h, fc1_ref[0:H, :], preferred_element_type=jnp.float32) + b1,
            0.0)                                                     # (R, 512)
        head_t = jnp.dot(z_t, fc23_ref[0:FC_DIM, :],
                         preferred_element_type=jnp.float32) + b23   # (R, 2Z)
        out_ref[t * R:(t + 1) * R, 0:Z2] = head_t                    # [mu | log_var]
        out_ref[t * R:(t + 1) * R, Z2:Z2 + H] = h                    # hidden_outputs / h_n


# ----------------------------------------------------------------------------
# Wrappers
# ----------------------------------------------------------------------------
def encoder_layers_forward_batched(xb, pp):
    """xb: (B, L, N, I) -> mu (B, L*N, Z), log_var (B, L*N, Z), hidden_state (B, L, H)."""
    B, L, Nr, I = xb.shape
    assert Nr == ROWS and I == BASE_SIZE, "kernel specialized to N=8 rows, 4 input features"
    assert L == Nr, "original forward's h_n reshape requires seq_len == batch rows"
    H, Z = HIDDEN_DIM, LATENT_DIMS
    LN = L * Nr

    # Pad features 4 -> 8 (sublane-aligned K for the MXU); the extra ones-column
    # folds the LSTM bias into the hoisted input projection.
    x_flat = xb.reshape(B, LN, I).astype(jnp.float32)
    x_aug = jnp.concatenate(
        [x_flat,
         jnp.zeros((B, LN, I_AUG - I - 1), jnp.float32),
         jnp.ones((B, LN, 1), jnp.float32)],
        axis=-1)

    slab = pl.pallas_call(
        _encoder_kernel,
        out_shape=jax.ShapeDtypeStruct((B, LN, OUT_W), jnp.float32),
        grid_spec=pltpu.PrefetchScalarGridSpec(
            num_scalar_prefetch=0,
            grid=(B,),
            in_specs=[
                pl.BlockSpec((None, LN, I_AUG), lambda b: (b, 0, 0)),
                # Packed parameters: same block index every grid step -> DMA'd once.
                pl.BlockSpec((I_AUG + H, 4 * H), lambda b: (0, 0)),
                pl.BlockSpec((H + ROWS, FC_DIM), lambda b: (0, 0)),
                pl.BlockSpec((FC_DIM + ROWS, 2 * Z), lambda b: (0, 0)),
            ],
            out_specs=pl.BlockSpec((None, LN, OUT_W), lambda b: (b, 0, 0)),
        ),
        compiler_params=pltpu.CompilerParams(dimension_semantics=("parallel",)),
    )(x_aug, pp["lstm_pack"], pp["fc1_pack"], pp["fc23_pack"])

    mu = slab[:, :, 0:Z]
    log_var = slab[:, :, Z:2 * Z]
    h_n = slab[:, (L - 1) * Nr:, 2 * Z:2 * Z + H]     # final-step h == h_n (n_layers == 1)
    hidden_state = h_n.reshape(B, L, H)               # valid because L == N, n_layers == 1
    return mu, log_var, hidden_state


def encoder_layers_forward(x, pp):
    """Single-instance path matching the original module signature: x (L, N, I)."""
    mu, log_var, hidden_state = encoder_layers_forward_batched(x[None], pp)
    return mu[0], log_var[0], hidden_state[0]


encoder_layers_forward_batched_jit = jax.jit(encoder_layers_forward_batched)
encoder_layers_forward_jit = jax.jit(encoder_layers_forward)


# ----------------------------------------------------------------------------
# Parameter init (deterministic, PyTorch-style uniform bounds) + one-time prep
# ----------------------------------------------------------------------------
def init_params(key):
    ks = jax.random.split(key, 10)

    def u(k, shape, bound):
        return jax.random.uniform(k, shape, jnp.float32, -bound, bound)

    k_lstm = 1.0 / math.sqrt(HIDDEN_DIM)
    k_l1 = 1.0 / math.sqrt(HIDDEN_DIM)
    k_l23 = 1.0 / math.sqrt(FC_DIM)
    return {
        # nn.LSTM(BASE_SIZE, HIDDEN_DIM, 1) parameters (PyTorch shapes)
        "w_ih": u(ks[0], (4 * HIDDEN_DIM, BASE_SIZE), k_lstm),
        "w_hh": u(ks[1], (4 * HIDDEN_DIM, HIDDEN_DIM), k_lstm),
        "b_ih": u(ks[2], (4 * HIDDEN_DIM,), k_lstm),
        "b_hh": u(ks[3], (4 * HIDDEN_DIM,), k_lstm),
        # nn.Linear(hidden_dim, 512)
        "w1": u(ks[4], (FC_DIM, HIDDEN_DIM), k_l1),
        "b1": u(ks[5], (FC_DIM,), k_l1),
        # nn.Linear(512, latent_dims) x2
        "w2": u(ks[6], (LATENT_DIMS, FC_DIM), k_l23),
        "b2": u(ks[7], (LATENT_DIMS,), k_l23),
        "w3": u(ks[8], (LATENT_DIMS, FC_DIM), k_l23),
        "b3": u(ks[9], (LATENT_DIMS,), k_l23),
    }


def prepare_params(p):
    """One-time packing: 3 arrays total, pre-transposed, biases folded/replicated,
    g-gate columns pre-doubled so tanh(g) = 2*sigmoid(2g) - 1 inside the kernel."""
    H, Z, R = HIDDEN_DIM, LATENT_DIMS, ROWS
    scale = jnp.ones((4 * H,), jnp.float32).at[2 * H:3 * H].set(2.0)

    w_ih_t = p["w_ih"].T * scale            # (I, 4H)
    w_hh_t = p["w_hh"].T * scale            # (H, 4H)
    b = (p["b_ih"] + p["b_hh"]) * scale     # (4H,)

    # lstm_pack rows: [0:4]=W_ih^T, [4:7]=0, [7]=bias (picked up by x's ones-col), [8:40]=W_hh^T
    lstm_pack = jnp.zeros((I_AUG + H, 4 * H), jnp.float32)
    lstm_pack = lstm_pack.at[0:BASE_SIZE, :].set(w_ih_t)
    lstm_pack = lstm_pack.at[I_AUG - 1, :].set(b)
    lstm_pack = lstm_pack.at[I_AUG:, :].set(w_hh_t)

    # fc1_pack rows: [0:32]=W1^T, [32:40]=b1 replicated (exact-shape add in kernel)
    fc1_pack = jnp.concatenate(
        [p["w1"].T, jnp.broadcast_to(p["b1"][None, :], (R, FC_DIM))], axis=0)

    # fc23_pack rows: [0:512]=[W2^T | W3^T], [512:520]=[b2 | b3] replicated
    w23_t = jnp.concatenate([p["w2"].T, p["w3"].T], axis=1)          # (512, 2Z)
    b23 = jnp.concatenate([p["b2"], p["b3"]])[None, :]               # (1, 2Z)
    fc23_pack = jnp.concatenate(
        [w23_t, jnp.broadcast_to(b23, (R, 2 * Z))], axis=0)

    return {"lstm_pack": lstm_pack, "fc1_pack": fc1_pack, "fc23_pack": fc23_pack}


# ----------------------------------------------------------------------------
# Pure-JAX reference for validation
# ----------------------------------------------------------------------------
def reference_forward(x, p):
    L, N, _ = x.shape
    H = HIDDEN_DIM

    def step(carry, x_t):
        h, c = carry
        gates = x_t @ p["w_ih"].T + p["b_ih"] + h @ p["w_hh"].T + p["b_hh"]
        i = jax.nn.sigmoid(gates[:, 0:H])
        f = jax.nn.sigmoid(gates[:, H:2 * H])
        g = jnp.tanh(gates[:, 2 * H:3 * H])
        o = jax.nn.sigmoid(gates[:, 3 * H:4 * H])
        c = f * c + i * g
        h = o * jnp.tanh(c)
        return (h, c), h

    (h_n, _), outs = jax.lax.scan(
        step, (jnp.zeros((N, H), jnp.float32), jnp.zeros((N, H), jnp.float32)), x)
    ho = outs.reshape(-1, H)
    hidden_state = h_n.reshape(x.shape[0], H)
    z = jax.nn.relu(ho @ p["w1"].T + p["b1"])
    mu = z @ p["w2"].T + p["b2"]
    lv = z @ p["w3"].T + p["b3"]
    return mu, lv, hidden_state


if __name__ == "__main__":
    key = jax.random.PRNGKey(0)
    kx, kp = jax.random.split(key)

    B = 4                               # independent forward passes in one pallas_call
    xb = jax.random.normal(kx, (B, SEQ_LEN, ROWS, BASE_SIZE), jnp.float32)
    params = init_params(kp)
    prepped = prepare_params(params)

    # Batched path: one kernel launch, grid over B (parallel -> both TCs on v7x).
    mu_b, lv_b, hs_b = encoder_layers_forward_batched_jit(xb, prepped)
    jax.block_until_ready((mu_b, lv_b, hs_b))

    # Single-instance path (original module signature).
    mu, log_var, hidden_state = encoder_layers_forward_jit(xb[0], prepped)
    jax.block_until_ready((mu, log_var, hidden_state))

    assert mu.shape == (SEQ_LEN * ROWS, LATENT_DIMS)
    assert log_var.shape == (SEQ_LEN * ROWS, LATENT_DIMS)
    assert hidden_state.shape == (SEQ_LEN, HIDDEN_DIM)

    # Validate every batched instance against the pure-JAX reference.
    # (tolerance slightly looser than 1e-4: tanh-via-sigmoid rewrite is exact
    #  mathematically but uses a different EUP approximation path.)
    for b in range(B):
        mu_r, lv_r, hs_r = reference_forward(xb[b], params)
        assert np.allclose(np.asarray(mu_b[b]), np.asarray(mu_r), atol=2e-3, rtol=2e-3)
        assert np.allclose(np.asarray(lv_b[b]), np.asarray(lv_r), atol=2e-3, rtol=2e-3)
        assert np.allclose(np.asarray(hs_b[b]), np.asarray(hs_r), atol=2e-3, rtol=2e-3)

    mu_r, lv_r, hs_r = reference_forward(xb[0], params)
    assert np.allclose(np.asarray(mu), np.asarray(mu_r), atol=2e-3, rtol=2e-3)
    assert np.allclose(np.asarray(log_var), np.asarray(lv_r), atol=2e-3, rtol=2e-3)
    assert np.allclose(np.asarray(hidden_state), np.asarray(hs_r), atol=2e-3, rtol=2e-3)

    print("KERNEL_OK")
</pallas_src>

<mosaic_0001>
module attributes {stable_mosaic.version = 11 : i64} {
  func.func @_encoder_kernel(%arg0: i32, %arg1: memref<1x64x8xf32, #tpu.memory_space<vmem>>, %arg2: memref<40x128xf32, #tpu.memory_space<vmem>>, %arg3: memref<40x512xf32, #tpu.memory_space<vmem>>, %arg4: memref<520x32xf32, #tpu.memory_space<vmem>>, %arg5: memref<1x64x64xf32, #tpu.memory_space<vmem>>) attributes {dimension_semantics = [#tpu.dimension_semantics<parallel>], iteration_bounds = array<i64: 4>, scalar_prefetch = 0 : i64, scratch_operands = 0 : i64, tpu.core_type = #tpu.core_type<tc>, window_params = [{transform_indices = @transform_0, window_bounds = array<i64: 1, 64, 8>}, {pipeline_mode = #tpu.pipeline_mode<synchronous>, transform_indices = @transform_1, window_bounds = array<i64: 40, 128>}, {pipeline_mode = #tpu.pipeline_mode<synchronous>, transform_indices = @transform_2, window_bounds = array<i64: 40, 512>}, {pipeline_mode = #tpu.pipeline_mode<synchronous>, transform_indices = @transform_3, window_bounds = array<i64: 520, 32>}, {transform_indices = @transform_4, window_bounds = array<i64: 1, 64, 64>}]} {
    %c0 = arith.constant 0 : index
    %c0_0 = arith.constant 0 : index
    %c0_1 = arith.constant 0 : index
    %0 = vector.load %arg1[%c0, %c0_0, %c0_1] : memref<1x64x8xf32, #tpu.memory_space<vmem>>, vector<1x64x8xf32>
    %1 = vector.shape_cast %0 : vector<1x64x8xf32> to vector<64x8xf32>
    %c0_2 = arith.constant 0 : index
    %c0_3 = arith.constant 0 : index
    %2 = vector.load %arg2[%c0_2, %c0_3] : memref<40x128xf32, #tpu.memory_space<vmem>>, vector<8x128xf32>
    %cst = arith.constant dense<0.000000e+00> : vector<64x128xf32>
    %3 = tpu.matmul %1, %2, %cst {dimension_numbers = #tpu.dot_dimension_numbers<[1], [0], [0], [1], [0, 0, 1, 1], [], []>} : vector<64x8xf32>, vector<8x128xf32>, vector<64x128xf32> -> vector<64x128xf32>
    %c8 = arith.constant 8 : index
    %c0_4 = arith.constant 0 : index
    %4 = vector.load %arg2[%c8, %c0_4] : memref<40x128xf32, #tpu.memory_space<vmem>>, vector<32x128xf32>
    %c32 = arith.constant 32 : index
    %c0_5 = arith.constant 0 : index
    %5 = vector.load %arg3[%c32, %c0_5] : memref<40x512xf32, #tpu.memory_space<vmem>>, vector<8x512xf32>
    %c512 = arith.constant 512 : index
    %c0_6 = arith.constant 0 : index
    %6 = vector.load %arg4[%c512, %c0_6] : memref<520x32xf32, #tpu.memory_space<vmem>>, vector<8x32xf32>
    %cst_7 = arith.constant 0.000000e+00 : f32
    %7 = vector.broadcast %cst_7 : f32 to vector<8x32xf32>
    %cst_8 = arith.constant 0.000000e+00 : f32
    %8 = vector.broadcast %cst_8 : f32 to vector<8x32xf32>
    %9 = vector.extract_strided_slice %3 {offsets = [0, 0], sizes = [8, 128], strides = [1, 1]} : vector<64x128xf32> to vector<8x128xf32>
    %cst_9 = arith.constant dense<0.000000e+00> : vector<8x128xf32>
    %10 = tpu.matmul %7, %4, %cst_9 {dimension_numbers = #tpu.dot_dimension_numbers<[1], [0], [0], [1], [0, 0, 1, 1], [], []>} : vector<8x32xf32>, vector<32x128xf32>, vector<8x128xf32> -> vector<8x128xf32>
    %11 = arith.addf %9, %10 : vector<8x128xf32>
    %12 = arith.negf %11 : vector<8x128xf32>
    %13 = math.exp %12 : vector<8x128xf32>
    %cst_10 = arith.constant 1.000000e+00 : f32
    %14 = vector.broadcast %cst_10 : f32 to vector<8x128xf32>
    %15 = arith.addf %14, %13 : vector<8x128xf32>
    %16 = arith.divf %14, %15 : vector<8x128xf32>
    %17 = vector.extract_strided_slice %16 {offsets = [0, 0], sizes = [8, 32], strides = [1, 1]} : vector<8x128xf32> to vector<8x32xf32>
    %18 = vector.extract_strided_slice %16 {offsets = [0, 32], sizes = [8, 32], strides = [1, 1]} : vector<8x128xf32> to vector<8x32xf32>
    %19 = vector.extract_strided_slice %16 {offsets = [0, 64], sizes = [8, 32], strides = [1, 1]} : vector<8x128xf32> to vector<8x32xf32>
    %cst_11 = arith.constant 2.000000e+00 : f32
    %20 = vector.broadcast %cst_11 : f32 to vector<8x32xf32>
    %21 = arith.mulf %20, %19 : vector<8x32xf32>
    %cst_12 = arith.constant 1.000000e+00 : f32
    %22 = vector.broadcast %cst_12 : f32 to vector<8x32xf32>
    %23 = arith.subf %21, %22 : vector<8x32xf32>
    %24 = vector.extract_strided_slice %16 {offsets = [0, 96], sizes = [8, 32], strides = [1, 1]} : vector<8x128xf32> to vector<8x32xf32>
    %25 = arith.mulf %18, %8 : vector<8x32xf32>
    %26 = arith.mulf %17, %23 : vector<8x32xf32>
    %27 = arith.addf %25, %26 : vector<8x32xf32>
    %28 = math.tanh %27 : vector<8x32xf32>
    %29 = arith.mulf %24, %28 : vector<8x32xf32>
    %c0_13 = arith.constant 0 : index
    %c0_14 = arith.constant 0 : index
    %30 = vector.load %arg3[%c0_13, %c0_14] : memref<40x512xf32, #tpu.memory_space<vmem>>, vector<32x512xf32>
    %cst_15 = arith.constant dense<0.000000e+00> : vector<8x512xf32>
    %31 = tpu.matmul %29, %30, %cst_15 {dimension_numbers = #tpu.dot_dimension_numbers<[1], [0], [0], [1], [0, 0, 1, 1], [], []>} : vector<8x32xf32>, vector<32x512xf32>, vector<8x512xf32> -> vector<8x512xf32>
    %32 = arith.addf %31, %5 : vector<8x512xf32>
    %cst_16 = arith.constant 0.000000e+00 : f32
    %33 = vector.broadcast %cst_16 : f32 to vector<8x512xf32>
    %34 = arith.maximumf %32, %33 : vector<8x512xf32>
    %c0_17 = arith.constant 0 : index
    %c0_18 = arith.constant 0 : index
    %35 = vector.load %arg4[%c0_17, %c0_18] : memref<520x32xf32, #tpu.memory_space<vmem>>, vector<512x32xf32>
    %cst_19 = arith.constant dense<0.000000e+00> : vector<8x32xf32>
    %36 = tpu.matmul %34, %35, %cst_19 {dimension_numbers = #tpu.dot_dimension_numbers<[1], [0], [0], [1], [0, 0, 1, 1], [], []>} : vector<8x512xf32>, vector<512x32xf32>, vector<8x32xf32> -> vector<8x32xf32>
    %37 = arith.addf %36, %6 : vector<8x32xf32>
    %c0_20 = arith.constant 0 : index
    %c0_21 = arith.constant 0 : index
    %c0_22 = arith.constant 0 : index
    %38 = vector.load %arg5[%c0_20, %c0_21, %c0_22] : memref<1x64x64xf32, #tpu.memory_space<vmem>>, vector<1x8x32xf32>
    %39 = vector.shape_cast %38 : vector<1x8x32xf32> to vector<8x32xf32>
    %40 = vector.shape_cast %37 : vector<8x32xf32> to vector<1x8x32xf32>
    tpu.vector_store %arg5[%c0_20, %c0_21, %c0_22], %40 {strides = array<i32>} : memref<1x64x64xf32, #tpu.memory_space<vmem>>, vector<1x8x32xf32>,
    %c0_23 = arith.constant 0 : index
    %c0_24 = arith.constant 0 : index
    %c32_25 = arith.constant 32 : index
    %41 = vector.load %arg5[%c0_23, %c0_24, %c32_25] : memref<1x64x64xf32, #tpu.memory_space<vmem>>, vector<1x8x32xf32>
    %42 = vector.shape_cast %41 : vector<1x8x32xf32> to vector<8x32xf32>
    %43 = vector.shape_cast %29 : vector<8x32xf32> to vector<1x8x32xf32>
    tpu.vector_store %arg5[%c0_23, %c0_24, %c32_25], %43 {strides = array<i32>} : memref<1x64x64xf32, #tpu.memory_space<vmem>>, vector<1x8x32xf32>,
    %44 = vector.extract_strided_slice %3 {offsets = [8, 0], sizes = [8, 128], strides = [1, 1]} : vector<64x128xf32> to vector<8x128xf32>
    %cst_26 = arith.constant dense<0.000000e+00> : vector<8x128xf32>
    %45 = tpu.matmul %29, %4, %cst_26 {dimension_numbers = #tpu.dot_dimension_numbers<[1], [0], [0], [1], [0, 0, 1, 1], [], []>} : vector<8x32xf32>, vector<32x128xf32>, vector<8x128xf32> -> vector<8x128xf32>
    %46 = arith.addf %44, %45 : vector<8x128xf32>
    %47 = arith.negf %46 : vector<8x128xf32>
    %48 = math.exp %47 : vector<8x128xf32>
    %cst_27 = arith.constant 1.000000e+00 : f32
    %49 = vector.broadcast %cst_27 : f32 to vector<8x128xf32>
    %50 = arith.addf %49, %48 : vector<8x128xf32>
    %51 = arith.divf %49, %50 : vector<8x128xf32>
    %52 = vector.extract_strided_slice %51 {offsets = [0, 0], sizes = [8, 32], strides = [1, 1]} : vector<8x128xf32> to vector<8x32xf32>
    %53 = vector.extract_strided_slice %51 {offsets = [0, 32], sizes = [8, 32], strides = [1, 1]} : vector<8x128xf32> to vector<8x32xf32>
    %54 = vector.extract_strided_slice %51 {offsets = [0, 64], sizes = [8, 32], strides = [1, 1]} : vector<8x128xf32> to vector<8x32xf32>
    %cst_28 = arith.constant 2.000000e+00 : f32
    %55 = vector.broadcast %cst_28 : f32 to vector<8x32xf32>
    %56 = arith.mulf %55, %54 : vector<8x32xf32>
    %cst_29 = arith.constant 1.000000e+00 : f32
    %57 = vector.broadcast %cst_29 : f32 to vector<8x32xf32>
    %58 = arith.subf %56, %57 : vector<8x32xf32>
    %59 = vector.extract_strided_slice %51 {offsets = [0, 96], sizes = [8, 32], strides = [1, 1]} : vector<8x128xf32> to vector<8x32xf32>
    %60 = arith.mulf %53, %27 : vector<8x32xf32>
    %61 = arith.mulf %52, %58 : vector<8x32xf32>
    %62 = arith.addf %60, %61 : vector<8x32xf32>
    %63 = math.tanh %62 : vector<8x32xf32>
    %64 = arith.mulf %59, %63 : vector<8x32xf32>
    %c0_30 = arith.constant 0 : index
    %c0_31 = arith.constant 0 : index
    %65 = vector.load %arg3[%c0_30, %c0_31] : memref<40x512xf32, #tpu.memory_space<vmem>>, vector<32x512xf32>
    %cst_32 = arith.constant dense<0.000000e+00> : vector<8x512xf32>
    %66 = tpu.matmul %64, %65, %cst_32 {dimension_numbers = #tpu.dot_dimension_numbers<[1], [0], [0], [1], [0, 0, 1, 1], [], []>} : vector<8x32xf32>, vector<32x512xf32>, vector<8x512xf32> -> vector<8x512xf32>
    %67 = arith.addf %66, %5 : vector<8x512xf32>
    %cst_33 = arith.constant 0.000000e+00 : f32
    %68 = vector.broadcast %cst_33 : f32 to vector<8x512xf32>
    %69 = arith.maximumf %67, %68 : vector<8x512xf32>
    %c0_34 = arith.constant 0 : index
    %c0_35 = arith.constant 0 : index
    %70 = vector.load %arg4[%c0_34, %c0_35] : memref<520x32xf32, #tpu.memory_space<vmem>>, vector<512x32xf32>
    %cst_36 = arith.constant dense<0.000000e+00> : vector<8x32xf32>
    %71 = tpu.matmul %69, %70, %cst_36 {dimension_numbers = #tpu.dot_dimension_numbers<[1], [0], [0], [1], [0, 0, 1, 1], [], []>} : vector<8x512xf32>, vector<512x32xf32>, vector<8x32xf32> -> vector<8x32xf32>
    %72 = arith.addf %71, %6 : vector<8x32xf32>
    %c0_37 = arith.constant 0 : index
    %c8_38 = arith.constant 8 : index
    %c0_39 = arith.constant 0 : index
    %73 = vector.load %arg5[%c0_37, %c8_38, %c0_39] : memref<1x64x64xf32, #tpu.memory_space<vmem>>, vector<1x8x32xf32>
    %74 = vector.shape_cast %73 : vector<1x8x32xf32> to vector<8x32xf32>
    %75 = vector.shape_cast %72 : vector<8x32xf32> to vector<1x8x32xf32>
    tpu.vector_store %arg5[%c0_37, %c8_38, %c0_39], %75 {strides = array<i32>} : memref<1x64x64xf32, #tpu.memory_space<vmem>>, vector<1x8x32xf32>,
    %c0_40 = arith.constant 0 : index
    %c8_41 = arith.constant 8 : index
    %c32_42 = arith.constant 32 : index
    %76 = vector.load %arg5[%c0_40, %c8_41, %c32_42] : memref<1x64x64xf32, #tpu.memory_space<vmem>>, vector<1x8x32xf32>
    %77 = vector.shape_cast %76 : vector<1x8x32xf32> to vector<8x32xf32>
    %78 = vector.shape_cast %64 : vector<8x32xf32> to vector<1x8x32xf32>
    tpu.vector_store %arg5[%c0_40, %c8_41, %c32_42], %78 {strides = array<i32>} : memref<1x64x64xf32, #tpu.memory_space<vmem>>, vector<1x8x32xf32>,
    %79 = vector.extract_strided_slice %3 {offsets = [16, 0], sizes = [8, 128], strides = [1, 1]} : vector<64x128xf32> to vector<8x128xf32>
    %cst_43 = arith.constant dense<0.000000e+00> : vector<8x128xf32>
    %80 = tpu.matmul %64, %4, %cst_43 {dimension_numbers = #tpu.dot_dimension_numbers<[1], [0], [0], [1], [0, 0, 1, 1], [], []>} : vector<8x32xf32>, vector<32x128xf32>, vector<8x128xf32> -> vector<8x128xf32>
    %81 = arith.addf %79, %80 : vector<8x128xf32>
    %82 = arith.negf %81 : vector<8x128xf32>
    %83 = math.exp %82 : vector<8x128xf32>
    %cst_44 = arith.constant 1.000000e+00 : f32
    %84 = vector.broadcast %cst_44 : f32 to vector<8x128xf32>
    %85 = arith.addf %84, %83 : vector<8x128xf32>
    %86 = arith.divf %84, %85 : vector<8x128xf32>
    %87 = vector.extract_strided_slice %86 {offsets = [0, 0], sizes = [8, 32], strides = [1, 1]} : vector<8x128xf32> to vector<8x32xf32>
    %88 = vector.extract_strided_slice %86 {offsets = [0, 32], sizes = [8, 32], strides = [1, 1]} : vector<8x128xf32> to vector<8x32xf32>
    %89 = vector.extract_strided_slice %86 {offsets = [0, 64], sizes = [8, 32], strides = [1, 1]} : vector<8x128xf32> to vector<8x32xf32>
    %cst_45 = arith.constant 2.000000e+00 : f32
    %90 = vector.broadcast %cst_45 : f32 to vector<8x32xf32>
    %91 = arith.mulf %90, %89 : vector<8x32xf32>
    %cst_46 = arith.constant 1.000000e+00 : f32
    %92 = vector.broadcast %cst_46 : f32 to vector<8x32xf32>
    %93 = arith.subf %91, %92 : vector<8x32xf32>
    %94 = vector.extract_strided_slice %86 {offsets = [0, 96], sizes = [8, 32], strides = [1, 1]} : vector<8x128xf32> to vector<8x32xf32>
    %95 = arith.mulf %88, %62 : vector<8x32xf32>
    %96 = arith.mulf %87, %93 : vector<8x32xf32>
    %97 = arith.addf %95, %96 : vector<8x32xf32>
    %98 = math.tanh %97 : vector<8x32xf32>
    %99 = arith.mulf %94, %98 : vector<8x32xf32>
    %c0_47 = arith.constant 0 : index
    %c0_48 = arith.constant 0 : index
    %100 = vector.load %arg3[%c0_47, %c0_48] : memref<40x512xf32, #tpu.memory_space<vmem>>, vector<32x512xf32>
    %cst_49 = arith.constant dense<0.000000e+00> : vector<8x512xf32>
    %101 = tpu.matmul %99, %100, %cst_49 {dimension_numbers = #tpu.dot_dimension_numbers<[1], [0], [0], [1], [0, 0, 1, 1], [], []>} : vector<8x32xf32>, vector<32x512xf32>, vector<8x512xf32> -> vector<8x512xf32>
    %102 = arith.addf %101, %5 : vector<8x512xf32>
    %cst_50 = arith.constant 0.000000e+00 : f32
    %103 = vector.broadcast %cst_50 : f32 to vector<8x512xf32>
    %104 = arith.maximumf %102, %103 : vector<8x512xf32>
    %c0_51 = arith.constant 0 : index
    %c0_52 = arith.constant 0 : index
    %105 = vector.load %arg4[%c0_51, %c0_52] : memref<520x32xf32, #tpu.memory_space<vmem>>, vector<512x32xf32>
    %cst_53 = arith.constant dense<0.000000e+00> : vector<8x32xf32>
    %106 = tpu.matmul %104, %105, %cst_53 {dimension_numbers = #tpu.dot_dimension_numbers<[1], [0], [0], [1], [0, 0, 1, 1], [], []>} : vector<8x512xf32>, vector<512x32xf32>, vector<8x32xf32> -> vector<8x32xf32>
    %107 = arith.addf %106, %6 : vector<8x32xf32>
    %c0_54 = arith.constant 0 : index
    %c16 = arith.constant 16 : index
    %c0_55 = arith.constant 0 : index
    %108 = vector.load %arg5[%c0_54, %c16, %c0_55] : memref<1x64x64xf32, #tpu.memory_space<vmem>>, vector<1x8x32xf32>
    %109 = vector.shape_cast %108 : vector<1x8x32xf32> to vector<8x32xf32>
    %110 = vector.shape_cast %107 : vector<8x32xf32> to vector<1x8x32xf32>
    tpu.vector_store %arg5[%c0_54, %c16, %c0_55], %110 {strides = array<i32>} : memref<1x64x64xf32, #tpu.memory_space<vmem>>, vector<1x8x32xf32>,
    %c0_56 = arith.constant 0 : index
    %c16_57 = arith.constant 16 : index
    %c32_58 = arith.constant 32 : index
    %111 = vector.load %arg5[%c0_56, %c16_57, %c32_58] : memref<1x64x64xf32, #tpu.memory_space<vmem>>, vector<1x8x32xf32>
    %112 = vector.shape_cast %111 : vector<1x8x32xf32> to vector<8x32xf32>
    %113 = vector.shape_cast %99 : vector<8x32xf32> to vector<1x8x32xf32>
    tpu.vector_store %arg5[%c0_56, %c16_57, %c32_58], %113 {strides = array<i32>} : memref<1x64x64xf32, #tpu.memory_space<vmem>>, vector<1x8x32xf32>,
    %114 = vector.extract_strided_slice %3 {offsets = [24, 0], sizes = [8, 128], strides = [1, 1]} : vector<64x128xf32> to vector<8x128xf32>
    %cst_59 = arith.constant dense<0.000000e+00> : vector<8x128xf32>
    %115 = tpu.matmul %99, %4, %cst_59 {dimension_numbers = #tpu.dot_dimension_numbers<[1], [0], [0], [1], [0, 0, 1, 1], [], []>} : vector<8x32xf32>, vector<32x128xf32>, vector<8x128xf32> -> vector<8x128xf32>
    %116 = arith.addf %114, %115 : vector<8x128xf32>
    %117 = arith.negf %116 : vector<8x128xf32>
    %118 = math.exp %117 : vector<8x128xf32>
    %cst_60 = arith.constant 1.000000e+00 : f32
    %119 = vector.broadcast %cst_60 : f32 to vector<8x128xf32>
    %120 = arith.addf %119, %118 : vector<8x128xf32>
    %121 = arith.divf %119, %120 : vector<8x128xf32>
    %122 = vector.extract_strided_slice %121 {offsets = [0, 0], sizes = [8, 32], strides = [1, 1]} : vector<8x128xf32> to vector<8x32xf32>
    %123 = vector.extract_strided_slice %121 {offsets = [0, 32], sizes = [8, 32], strides = [1, 1]} : vector<8x128xf32> to vector<8x32xf32>
    %124 = vector.extract_strided_slice %121 {offsets = [0, 64], sizes = [8, 32], strides = [1, 1]} : vector<8x128xf32> to vector<8x32xf32>
    %cst_61 = arith.constant 2.000000e+00 : f32
    %125 = vector.broadcast %cst_61 : f32 to vector<8x32xf32>
    %126 = arith.mulf %125, %124 : vector<8x32xf32>
    %cst_62 = arith.constant 1.000000e+00 : f32
    %127 = vector.broadcast %cst_62 : f32 to vector<8x32xf32>
    %128 = arith.subf %126, %127 : vector<8x32xf32>
    %129 = vector.extract_strided_slice %121 {offsets = [0, 96], sizes = [8, 32], strides = [1, 1]} : vector<8x128xf32> to vector<8x32xf32>
    %130 = arith.mulf %123, %97 : vector<8x32xf32>
    %131 = arith.mulf %122, %128 : vector<8x32xf32>
    %132 = arith.addf %130, %131 : vector<8x32xf32>
    %133 = math.tanh %132 : vector<8x32xf32>
    %134 = arith.mulf %129, %133 : vector<8x32xf32>
    %c0_63 = arith.constant 0 : index
    %c0_64 = arith.constant 0 : index
    %135 = vector.load %arg3[%c0_63, %c0_64] : memref<40x512xf32, #tpu.memory_space<vmem>>, vector<32x512xf32>
    %cst_65 = arith.constant dense<0.000000e+00> : vector<8x512xf32>
    %136 = tpu.matmul %134, %135, %cst_65 {dimension_numbers = #tpu.dot_dimension_numbers<[1], [0], [0], [1], [0, 0, 1, 1], [], []>} : vector<8x32xf32>, vector<32x512xf32>, vector<8x512xf32> -> vector<8x512xf32>
    %137 = arith.addf %136, %5 : vector<8x512xf32>
    %cst_66 = arith.constant 0.000000e+00 : f32
    %138 = vector.broadcast %cst_66 : f32 to vector<8x512xf32>
    %139 = arith.maximumf %137, %138 : vector<8x512xf32>
    %c0_67 = arith.constant 0 : index
    %c0_68 = arith.constant 0 : index
    %140 = vector.load %arg4[%c0_67, %c0_68] : memref<520x32xf32, #tpu.memory_space<vmem>>, vector<512x32xf32>
    %cst_69 = arith.constant dense<0.000000e+00> : vector<8x32xf32>
    %141 = tpu.matmul %139, %140, %cst_69 {dimension_numbers = #tpu.dot_dimension_numbers<[1], [0], [0], [1], [0, 0, 1, 1], [], []>} : vector<8x512xf32>, vector<512x32xf32>, vector<8x32xf32> -> vector<8x32xf32>
    %142 = arith.addf %141, %6 : vector<8x32xf32>
    %c0_70 = arith.constant 0 : index
    %c24 = arith.constant 24 : index
    %c0_71 = arith.constant 0 : index
    %143 = vector.load %arg5[%c0_70, %c24, %c0_71] : memref<1x64x64xf32, #tpu.memory_space<vmem>>, vector<1x8x32xf32>
    %144 = vector.shape_cast %143 : vector<1x8x32xf32> to vector<8x32xf32>
    %145 = vector.shape_cast %142 : vector<8x32xf32> to vector<1x8x32xf32>
    tpu.vector_store %arg5[%c0_70, %c24, %c0_71], %145 {strides = array<i32>} : memref<1x64x64xf32, #tpu.memory_space<vmem>>, vector<1x8x32xf32>,
    %c0_72 = arith.constant 0 : index
    %c24_73 = arith.constant 24 : index
    %c32_74 = arith.constant 32 : index
    %146 = vector.load %arg5[%c0_72, %c24_73, %c32_74] : memref<1x64x64xf32, #tpu.memory_space<vmem>>, vector<1x8x32xf32>
    %147 = vector.shape_cast %146 : vector<1x8x32xf32> to vector<8x32xf32>
    %148 = vector.shape_cast %134 : vector<8x32xf32> to vector<1x8x32xf32>
    tpu.vector_store %arg5[%c0_72, %c24_73, %c32_74], %148 {strides = array<i32>} : memref<1x64x64xf32, #tpu.memory_space<vmem>>, vector<1x8x32xf32>,
    %149 = vector.extract_strided_slice %3 {offsets = [32, 0], sizes = [8, 128], strides = [1, 1]} : vector<64x128xf32> to vector<8x128xf32>
    %cst_75 = arith.constant dense<0.000000e+00> : vector<8x128xf32>
    %150 = tpu.matmul %134, %4, %cst_75 {dimension_numbers = #tpu.dot_dimension_numbers<[1], [0], [0], [1], [0, 0, 1, 1], [], []>} : vector<8x32xf32>, vector<32x128xf32>, vector<8x128xf32> -> vector<8x128xf32>
    %151 = arith.addf %149, %150 : vector<8x128xf32>
    %152 = arith.negf %151 : vector<8x128xf32>
    %153 = math.exp %152 : vector<8x128xf32>
    %cst_76 = arith.constant 1.000000e+00 : f32
    %154 = vector.broadcast %cst_76 : f32 to vector<8x128xf32>
    %155 = arith.addf %154, %153 : vector<8x128xf32>
    %156 = arith.divf %154, %155 : vector<8x128xf32>
    %157 = vector.extract_strided_slice %156 {offsets = [0, 0], sizes = [8, 32], strides = [1, 1]} : vector<8x128xf32> to vector<8x32xf32>
    %158 = vector.extract_strided_slice %156 {offsets = [0, 32], sizes = [8, 32], strides = [1, 1]} : vector<8x128xf32> to vector<8x32xf32>
    %159 = vector.extract_strided_slice %156 {offsets = [0, 64], sizes = [8, 32], strides = [1, 1]} : vector<8x128xf32> to vector<8x32xf32>
    %cst_77 = arith.constant 2.000000e+00 : f32
    %160 = vector.broadcast %cst_77 : f32 to vector<8x32xf32>
    %161 = arith.mulf %160, %159 : vector<8x32xf32>
    %cst_78 = arith.constant 1.000000e+00 : f32
    %162 = vector.broadcast %cst_78 : f32 to vector<8x32xf32>
    %163 = arith.subf %161, %162 : vector<8x32xf32>
    %164 = vector.extract_strided_slice %156 {offsets = [0, 96], sizes = [8, 32], strides = [1, 1]} : vector<8x128xf32> to vector<8x32xf32>
    %165 = arith.mulf %158, %132 : vector<8x32xf32>
    %166 = arith.mulf %157, %163 : vector<8x32xf32>
    %167 = arith.addf %165, %166 : vector<8x32xf32>
    %168 = math.tanh %167 : vector<8x32xf32>
    %169 = arith.mulf %164, %168 : vector<8x32xf32>
    %c0_79 = arith.constant 0 : index
    %c0_80 = arith.constant 0 : index
    %170 = vector.load %arg3[%c0_79, %c0_80] : memref<40x512xf32, #tpu.memory_space<vmem>>, vector<32x512xf32>
    %cst_81 = arith.constant dense<0.000000e+00> : vector<8x512xf32>
    %171 = tpu.matmul %169, %170, %cst_81 {dimension_numbers = #tpu.dot_dimension_numbers<[1], [0], [0], [1], [0, 0, 1, 1], [], []>} : vector<8x32xf32>, vector<32x512xf32>, vector<8x512xf32> -> vector<8x512xf32>
    %172 = arith.addf %171, %5 : vector<8x512xf32>
    %cst_82 = arith.constant 0.000000e+00 : f32
    %173 = vector.broadcast %cst_82 : f32 to vector<8x512xf32>
    %174 = arith.maximumf %172, %173 : vector<8x512xf32>
    %c0_83 = arith.constant 0 : index
    %c0_84 = arith.constant 0 : index
    %175 = vector.load %arg4[%c0_83, %c0_84] : memref<520x32xf32, #tpu.memory_space<vmem>>, vector<512x32xf32>
    %cst_85 = arith.constant dense<0.000000e+00> : vector<8x32xf32>
    %176 = tpu.matmul %174, %175, %cst_85 {dimension_numbers = #tpu.dot_dimension_numbers<[1], [0], [0], [1], [0, 0, 1, 1], [], []>} : vector<8x512xf32>, vector<512x32xf32>, vector<8x32xf32> -> vector<8x32xf32>
    %177 = arith.addf %176, %6 : vector<8x32xf32>
    %c0_86 = arith.constant 0 : index
    %c32_87 = arith.constant 32 : index
    %c0_88 = arith.constant 0 : index
    %178 = vector.load %arg5[%c0_86, %c32_87, %c0_88] : memref<1x64x64xf32, #tpu.memory_space<vmem>>, vector<1x8x32xf32>
    %179 = vector.shape_cast %178 : vector<1x8x32xf32> to vector<8x32xf32>
    %180 = vector.shape_cast %177 : vector<8x32xf32> to vector<1x8x32xf32>
    tpu.vector_store %arg5[%c0_86, %c32_87, %c0_88], %180 {strides = array<i32>} : memref<1x64x64xf32, #tpu.memory_space<vmem>>, vector<1x8x32xf32>,
    %c0_89 = arith.constant 0 : index
    %c32_90 = arith.constant 32 : index
    %c32_91 = arith.constant 32 : index
    %181 = vector.load %arg5[%c0_89, %c32_90, %c32_91] : memref<1x64x64xf32, #tpu.memory_space<vmem>>, vector<1x8x32xf32>
    %182 = vector.shape_cast %181 : vector<1x8x32xf32> to vector<8x32xf32>
    %183 = vector.shape_cast %169 : vector<8x32xf32> to vector<1x8x32xf32>
    tpu.vector_store %arg5[%c0_89, %c32_90, %c32_91], %183 {strides = array<i32>} : memref<1x64x64xf32, #tpu.memory_space<vmem>>, vector<1x8x32xf32>,
    %184 = vector.extract_strided_slice %3 {offsets = [40, 0], sizes = [8, 128], strides = [1, 1]} : vector<64x128xf32> to vector<8x128xf32>
    %cst_92 = arith.constant dense<0.000000e+00> : vector<8x128xf32>
    %185 = tpu.matmul %169, %4, %cst_92 {dimension_numbers = #tpu.dot_dimension_numbers<[1], [0], [0], [1], [0, 0, 1, 1], [], []>} : vector<8x32xf32>, vector<32x128xf32>, vector<8x128xf32> -> vector<8x128xf32>
    %186 = arith.addf %184, %185 : vector<8x128xf32>
    %187 = arith.negf %186 : vector<8x128xf32>
    %188 = math.exp %187 : vector<8x128xf32>
    %cst_93 = arith.constant 1.000000e+00 : f32
    %189 = vector.broadcast %cst_93 : f32 to vector<8x128xf32>
    %190 = arith.addf %189, %188 : vector<8x128xf32>
    %191 = arith.divf %189, %190 : vector<8x128xf32>
    %192 = vector.extract_strided_slice %191 {offsets = [0, 0], sizes = [8, 32], strides = [1, 1]} : vector<8x128xf32> to vector<8x32xf32>
    %193 = vector.extract_strided_slice %191 {offsets = [0, 32], sizes = [8, 32], strides = [1, 1]} : vector<8x128xf32> to vector<8x32xf32>
    %194 = vector.extract_strided_slice %191 {offsets = [0, 64], sizes = [8, 32], strides = [1, 1]} : vector<8x128xf32> to vector<8x32xf32>
    %cst_94 = arith.constant 2.000000e+00 : f32
    %195 = vector.broadcast %cst_94 : f32 to vector<8x32xf32>
    %196 = arith.mulf %195, %194 : vector<8x32xf32>
    %cst_95 = arith.constant 1.000000e+00 : f32
    %197 = vector.broadcast %cst_95 : f32 to vector<8x32xf32>
    %198 = arith.subf %196, %197 : vector<8x32xf32>
    %199 = vector.extract_strided_slice %191 {offsets = [0, 96], sizes = [8, 32], strides = [1, 1]} : vector<8x128xf32> to vector<8x32xf32>
    %200 = arith.mulf %193, %167 : vector<8x32xf32>
    %201 = arith.mulf %192, %198 : vector<8x32xf32>
    %202 = arith.addf %200, %201 : vector<8x32xf32>
    %203 = math.tanh %202 : vector<8x32xf32>
    %204 = arith.mulf %199, %203 : vector<8x32xf32>
    %c0_96 = arith.constant 0 : index
    %c0_97 = arith.constant 0 : index
    %205 = vector.load %arg3[%c0_96, %c0_97] : memref<40x512xf32, #tpu.memory_space<vmem>>, vector<32x512xf32>
    %cst_98 = arith.constant dense<0.000000e+00> : vector<8x512xf32>
    %206 = tpu.matmul %204, %205, %cst_98 {dimension_numbers = #tpu.dot_dimension_numbers<[1], [0], [0], [1], [0, 0, 1, 1], [], []>} : vector<8x32xf32>, vector<32x512xf32>, vector<8x512xf32> -> vector<8x512xf32>
    %207 = arith.addf %206, %5 : vector<8x512xf32>
    %cst_99 = arith.constant 0.000000e+00 : f32
    %208 = vector.broadcast %cst_99 : f32 to vector<8x512xf32>
    %209 = arith.maximumf %207, %208 : vector<8x512xf32>
    %c0_100 = arith.constant 0 : index
    %c0_101 = arith.constant 0 : index
    %210 = vector.load %arg4[%c0_100, %c0_101] : memref<520x32xf32, #tpu.memory_space<vmem>>, vector<512x32xf32>
    %cst_102 = arith.constant dense<0.000000e+00> : vector<8x32xf32>
    %211 = tpu.matmul %209, %210, %cst_102 {dimension_numbers = #tpu.dot_dimension_numbers<[1], [0], [0], [1], [0, 0, 1, 1], [], []>} : vector<8x512xf32>, vector<512x32xf32>, vector<8x32xf32> -> vector<8x32xf32>
    %212 = arith.addf %211, %6 : vector<8x32xf32>
    %c0_103 = arith.constant 0 : index
    %c40 = arith.constant 40 : index
    %c0_104 = arith.constant 0 : index
    %213 = vector.load %arg5[%c0_103, %c40, %c0_104] : memref<1x64x64xf32, #tpu.memory_space<vmem>>, vector<1x8x32xf32>
    %214 = vector.shape_cast %213 : vector<1x8x32xf32> to vector<8x32xf32>
    %215 = vector.shape_cast %212 : vector<8x32xf32> to vector<1x8x32xf32>
    tpu.vector_store %arg5[%c0_103, %c40, %c0_104], %215 {strides = array<i32>} : memref<1x64x64xf32, #tpu.memory_space<vmem>>, vector<1x8x32xf32>,
    %c0_105 = arith.constant 0 : index
    %c40_106 = arith.constant 40 : index
    %c32_107 = arith.constant 32 : index
    %216 = vector.load %arg5[%c0_105, %c40_106, %c32_107] : memref<1x64x64xf32, #tpu.memory_space<vmem>>, vector<1x8x32xf32>
    %217 = vector.shape_cast %216 : vector<1x8x32xf32> to vector<8x32xf32>
    %218 = vector.shape_cast %204 : vector<8x32xf32> to vector<1x8x32xf32>
    tpu.vector_store %arg5[%c0_105, %c40_106, %c32_107], %218 {strides = array<i32>} : memref<1x64x64xf32, #tpu.memory_space<vmem>>, vector<1x8x32xf32>,
    %219 = vector.extract_strided_slice %3 {offsets = [48, 0], sizes = [8, 128], strides = [1, 1]} : vector<64x128xf32> to vector<8x128xf32>
    %cst_108 = arith.constant dense<0.000000e+00> : vector<8x128xf32>
    %220 = tpu.matmul %204, %4, %cst_108 {dimension_numbers = #tpu.dot_dimension_numbers<[1], [0], [0], [1], [0, 0, 1, 1], [], []>} : vector<8x32xf32>, vector<32x128xf32>, vector<8x128xf32> -> vector<8x128xf32>
    %221 = arith.addf %219, %220 : vector<8x128xf32>
    %222 = arith.negf %221 : vector<8x128xf32>
    %223 = math.exp %222 : vector<8x128xf32>
    %cst_109 = arith.constant 1.000000e+00 : f32
    %224 = vector.broadcast %cst_109 : f32 to vector<8x128xf32>
    %225 = arith.addf %224, %223 : vector<8x128xf32>
    %226 = arith.divf %224, %225 : vector<8x128xf32>
    %227 = vector.extract_strided_slice %226 {offsets = [0, 0], sizes = [8, 32], strides = [1, 1]} : vector<8x128xf32> to vector<8x32xf32>
    %228 = vector.extract_strided_slice %226 {offsets = [0, 32], sizes = [8, 32], strides = [1, 1]} : vector<8x128xf32> to vector<8x32xf32>
    %229 = vector.extract_strided_slice %226 {offsets = [0, 64], sizes = [8, 32], strides = [1, 1]} : vector<8x128xf32> to vector<8x32xf32>
    %cst_110 = arith.constant 2.000000e+00 : f32
    %230 = vector.broadcast %cst_110 : f32 to vector<8x32xf32>
    %231 = arith.mulf %230, %229 : vector<8x32xf32>
    %cst_111 = arith.constant 1.000000e+00 : f32
    %232 = vector.broadcast %cst_111 : f32 to vector<8x32xf32>
    %233 = arith.subf %231, %232 : vector<8x32xf32>
    %234 = vector.extract_strided_slice %226 {offsets = [0, 96], sizes = [8, 32], strides = [1, 1]} : vector<8x128xf32> to vector<8x32xf32>
    %235 = arith.mulf %228, %202 : vector<8x32xf32>
    %236 = arith.mulf %227, %233 : vector<8x32xf32>
    %237 = arith.addf %235, %236 : vector<8x32xf32>
    %238 = math.tanh %237 : vector<8x32xf32>
    %239 = arith.mulf %234, %238 : vector<8x32xf32>
    %c0_112 = arith.constant 0 : index
    %c0_113 = arith.constant 0 : index
    %240 = vector.load %arg3[%c0_112, %c0_113] : memref<40x512xf32, #tpu.memory_space<vmem>>, vector<32x512xf32>
    %cst_114 = arith.constant dense<0.000000e+00> : vector<8x512xf32>
    %241 = tpu.matmul %239, %240, %cst_114 {dimension_numbers = #tpu.dot_dimension_numbers<[1], [0], [0], [1], [0, 0, 1, 1], [], []>} : vector<8x32xf32>, vector<32x512xf32>, vector<8x512xf32> -> vector<8x512xf32>
    %242 = arith.addf %241, %5 : vector<8x512xf32>
    %cst_115 = arith.constant 0.000000e+00 : f32
    %243 = vector.broadcast %cst_115 : f32 to vector<8x512xf32>
    %244 = arith.maximumf %242, %243 : vector<8x512xf32>
    %c0_116 = arith.constant 0 : index
    %c0_117 = arith.constant 0 : index
    %245 = vector.load %arg4[%c0_116, %c0_117] : memref<520x32xf32, #tpu.memory_space<vmem>>, vector<512x32xf32>
    %cst_118 = arith.constant dense<0.000000e+00> : vector<8x32xf32>
    %246 = tpu.matmul %244, %245, %cst_118 {dimension_numbers = #tpu.dot_dimension_numbers<[1], [0], [0], [1], [0, 0, 1, 1], [], []>} : vector<8x512xf32>, vector<512x32xf32>, vector<8x32xf32> -> vector<8x32xf32>
    %247 = arith.addf %246, %6 : vector<8x32xf32>
    %c0_119 = arith.constant 0 : index
    %c48 = arith.constant 48 : index
    %c0_120 = arith.constant 0 : index
    %248 = vector.load %arg5[%c0_119, %c48, %c0_120] : memref<1x64x64xf32, #tpu.memory_space<vmem>>, vector<1x8x32xf32>
    %249 = vector.shape_cast %248 : vector<1x8x32xf32> to vector<8x32xf32>
    %250 = vector.shape_cast %247 : vector<8x32xf32> to vector<1x8x32xf32>
    tpu.vector_store %arg5[%c0_119, %c48, %c0_120], %250 {strides = array<i32>} : memref<1x64x64xf32, #tpu.memory_space<vmem>>, vector<1x8x32xf32>,
    %c0_121 = arith.constant 0 : index
    %c48_122 = arith.constant 48 : index
    %c32_123 = arith.constant 32 : index
    %251 = vector.load %arg5[%c0_121, %c48_122, %c32_123] : memref<1x64x64xf32, #tpu.memory_space<vmem>>, vector<1x8x32xf32>
    %252 = vector.shape_cast %251 : vector<1x8x32xf32> to vector<8x32xf32>
    %253 = vector.shape_cast %239 : vector<8x32xf32> to vector<1x8x32xf32>
    tpu.vector_store %arg5[%c0_121, %c48_122, %c32_123], %253 {strides = array<i32>} : memref<1x64x64xf32, #tpu.memory_space<vmem>>, vector<1x8x32xf32>,
    %254 = vector.extract_strided_slice %3 {offsets = [56, 0], sizes = [8, 128], strides = [1, 1]} : vector<64x128xf32> to vector<8x128xf32>
    %cst_124 = arith.constant dense<0.000000e+00> : vector<8x128xf32>
    %255 = tpu.matmul %239, %4, %cst_124 {dimension_numbers = #tpu.dot_dimension_numbers<[1], [0], [0], [1], [0, 0, 1, 1], [], []>} : vector<8x32xf32>, vector<32x128xf32>, vector<8x128xf32> -> vector<8x128xf32>
    %256 = arith.addf %254, %255 : vector<8x128xf32>
    %257 = arith.negf %256 : vector<8x128xf32>
    %258 = math.exp %257 : vector<8x128xf32>
    %cst_125 = arith.constant 1.000000e+00 : f32
    %259 = vector.broadcast %cst_125 : f32 to vector<8x128xf32>
    %260 = arith.addf %259, %258 : vector<8x128xf32>
    %261 = arith.divf %259, %260 : vector<8x128xf32>
    %262 = vector.extract_strided_slice %261 {offsets = [0, 0], sizes = [8, 32], strides = [1, 1]} : vector<8x128xf32> to vector<8x32xf32>
    %263 = vector.extract_strided_slice %261 {offsets = [0, 32], sizes = [8, 32], strides = [1, 1]} : vector<8x128xf32> to vector<8x32xf32>
    %264 = vector.extract_strided_slice %261 {offsets = [0, 64], sizes = [8, 32], strides = [1, 1]} : vector<8x128xf32> to vector<8x32xf32>
    %cst_126 = arith.constant 2.000000e+00 : f32
    %265 = vector.broadcast %cst_126 : f32 to vector<8x32xf32>
    %266 = arith.mulf %265, %264 : vector<8x32xf32>
    %cst_127 = arith.constant 1.000000e+00 : f32
    %267 = vector.broadcast %cst_127 : f32 to vector<8x32xf32>
    %268 = arith.subf %266, %267 : vector<8x32xf32>
    %269 = vector.extract_strided_slice %261 {offsets = [0, 96], sizes = [8, 32], strides = [1, 1]} : vector<8x128xf32> to vector<8x32xf32>
    %270 = arith.mulf %263, %237 : vector<8x32xf32>
    %271 = arith.mulf %262, %268 : vector<8x32xf32>
    %272 = arith.addf %270, %271 : vector<8x32xf32>
    %273 = math.tanh %272 : vector<8x32xf32>
    %274 = arith.mulf %269, %273 : vector<8x32xf32>
    %c0_128 = arith.constant 0 : index
    %c0_129 = arith.constant 0 : index
    %275 = vector.load %arg3[%c0_128, %c0_129] : memref<40x512xf32, #tpu.memory_space<vmem>>, vector<32x512xf32>
    %cst_130 = arith.constant dense<0.000000e+00> : vector<8x512xf32>
    %276 = tpu.matmul %274, %275, %cst_130 {dimension_numbers = #tpu.dot_dimension_numbers<[1], [0], [0], [1], [0, 0, 1, 1], [], []>} : vector<8x32xf32>, vector<32x512xf32>, vector<8x512xf32> -> vector<8x512xf32>
    %277 = arith.addf %276, %5 : vector<8x512xf32>
    %cst_131 = arith.constant 0.000000e+00 : f32
    %278 = vector.broadcast %cst_131 : f32 to vector<8x512xf32>
    %279 = arith.maximumf %277, %278 : vector<8x512xf32>
    %c0_132 = arith.constant 0 : index
    %c0_133 = arith.constant 0 : index
    %280 = vector.load %arg4[%c0_132, %c0_133] : memref<520x32xf32, #tpu.memory_space<vmem>>, vector<512x32xf32>
    %cst_134 = arith.constant dense<0.000000e+00> : vector<8x32xf32>
    %281 = tpu.matmul %279, %280, %cst_134 {dimension_numbers = #tpu.dot_dimension_numbers<[1], [0], [0], [1], [0, 0, 1, 1], [], []>} : vector<8x512xf32>, vector<512x32xf32>, vector<8x32xf32> -> vector<8x32xf32>
    %282 = arith.addf %281, %6 : vector<8x32xf32>
    %c0_135 = arith.constant 0 : index
    %c56 = arith.constant 56 : index
    %c0_136 = arith.constant 0 : index
    %283 = vector.load %arg5[%c0_135, %c56, %c0_136] : memref<1x64x64xf32, #tpu.memory_space<vmem>>, vector<1x8x32xf32>
    %284 = vector.shape_cast %283 : vector<1x8x32xf32> to vector<8x32xf32>
    %285 = vector.shape_cast %282 : vector<8x32xf32> to vector<1x8x32xf32>
    tpu.vector_store %arg5[%c0_135, %c56, %c0_136], %285 {strides = array<i32>} : memref<1x64x64xf32, #tpu.memory_space<vmem>>, vector<1x8x32xf32>,
    %c0_137 = arith.constant 0 : index
    %c56_138 = arith.constant 56 : index
    %c32_139 = arith.constant 32 : index
    %286 = vector.load %arg5[%c0_137, %c56_138, %c32_139] : memref<1x64x64xf32, #tpu.memory_space<vmem>>, vector<1x8x32xf32>
    %287 = vector.shape_cast %286 : vector<1x8x32xf32> to vector<8x32xf32>
    %288 = vector.shape_cast %274 : vector<8x32xf32> to vector<1x8x32xf32>
    tpu.vector_store %arg5[%c0_137, %c56_138, %c32_139], %288 {strides = array<i32>} : memref<1x64x64xf32, #tpu.memory_space<vmem>>, vector<1x8x32xf32>,
    return
  }
  func.func @transform_0(%arg0: i32) -> (i32, i32, i32) {
    %c0_i32 = arith.constant 0 : i32
    %c0_i32_0 = arith.constant 0 : i32
    %c0_i32_1 = arith.constant 0 : i32
    return %arg0, %c0_i32, %c0_i32_0 : i32, i32, i32
  }
  func.func @transform_1(%arg0: i32) -> (i32, i32) {
    %c0_i32 = arith.constant 0 : i32
    %c0_i32_0 = arith.constant 0 : i32
    %c0_i32_1 = arith.constant 0 : i32
    return %c0_i32, %c0_i32_0 : i32, i32
  }
  func.func @transform_2(%arg0: i32) -> (i32, i32) {
    %c0_i32 = arith.constant 0 : i32
    %c0_i32_0 = arith.constant 0 : i32
    %c0_i32_1 = arith.constant 0 : i32
    return %c0_i32, %c0_i32_0 : i32, i32
  }
  func.func @transform_3(%arg0: i32) -> (i32, i32) {
    %c0_i32 = arith.constant 0 : i32
    %c0_i32_0 = arith.constant 0 : i32
    %c0_i32_1 = arith.constant 0 : i32
    return %c0_i32, %c0_i32_0 : i32, i32
  }
  func.func @transform_4(%arg0: i32) -> (i32, i32, i32) {
    %c0_i32 = arith.constant 0 : i32
    %c0_i32_0 = arith.constant 0 : i32
    %c0_i32_1 = arith.constant 0 : i32
    return %arg0, %c0_i32, %c0_i32_0 : i32, i32, i32
  }
}

</mosaic_0001>

<bundles_post_ra>
// kernel: encoder_layers_forward_batched.1
= control target key start
LH: loop header
LB: loop body
LE: loop exit
PB: predicated region body
PF: predicated region fallthrough
CT: control target
= control target key end

     0   :  { %s5745_s15 = smov 0   ;;  %s7441_s0 = inlined_call_operand.vmem [shape: f32[4,64,8], index: 0, kind: input, shape index: {}]   ;;  %s7442_s1 = inlined_call_operand.vmem [shape: f32[40,128], index: 1, kind: input, shape index: {}]   ;;  %s7443_s2 = inlined_call_operand.vmem [shape: f32[40,512], index: 2, kind: input, shape index: {}]   ;;  %s7444_s3 = inlined_call_operand.vmem [shape: f32[520,32], index: 3, kind: input, shape index: {}]   ;;  %s7445_s4 = inlined_call_operand.vmem [shape: f32[4,64,64], index: 4, kind: output, shape index: {}]  }
   0x1 LB: > { %s4182_s16 = sadd.s32 4294967295, %s5713_s15   ;;  %p4186_p0 = scmp.ge.s32.totalorder %s5713_s15, 1  ;;  %s5713_s15 = sphi %s5745_s15, %s14_s15  }
   0x2   : > { %p162_p1 = scmp.lt.s32.totalorder %s5713_s15, 5 }
   0x4   : > { %p163_p2 = pnand %p4186_p0, %p162_p1 }
   0x6   : > { %166 = sbr.rel (%p163_p2) target bundleno = 7812 (0x1e84), region = 36 }
   0xd   : > { %v337_v0 = vld [vmem:[%s7442_s1 + $0x8] sm:$0xff]  ;;  %v338_v1 = vld [vmem:[%s7442_s1 + $0x10] sm:$0xff]  ;;  %v206_v2 = vld [vmem:[%s7442_s1] sm:$0xff]  ;;  %p188_p3 = scmp.lt.s32.totalorder %s4182_s16, 3  ;;  %v7446_v3 = vmov 0.0|0.0   ;;  %vm5716_vm0 = vmmov 0  }
   0xe   : > { %4953 = vmatprep.subr.bf16.mxu1 %v7446_v3  ;;  %v5763_v4 = vpack.c.bf16 %v338_v1, %v337_v0  ;;  %4851 = vmatprep.subr.mxu0 %v206_v2  ;;  %v339_v5 = vld [vmem:[%s7442_s1 + $0x18] sm:$0xff]  ;;  %v340_v6 = vld [vmem:[%s7442_s1 + $0x20] sm:$0xff]  ;;  %v7448_v7 = vmov 0.0   ;;  %vm207_vm1 = vcmask 64512   ;;  %s5718_s5 = smov 64   ;;  %s5719_s6 = smov 32  }
   0xf   : > { %4852 = vmatpush3.msra.mxu0 %v206_v2  ;;  %s7487_s16 = smov (!%p188_p3, %s4182_s16), 3  ;;  %4873 = vmatprep.mubr.msk.f32.mxu1 %vm5716_vm0, %v7448_v7  ;;  %v5776_v8 = vpack.c.bf16 %v340_v6, %v339_v5  ;;  %v447_v31 = vld [vmem:[%s7443_s2 + $0x8] sm:$0xff]  ;;  %v449_v34 = vld [vmem:[%s7443_s2 + $0x18] sm:$0xff]  ;;  %v446_v36 = vld [vmem:[%s7443_s2] sm:$0xff]  ;;  %vm346_vm2 = vcmask 261120   ;;  %vm821_vm3 = vcmask 523520  }
  0x10   : > { %4955 = vmatpush3.bf16.msra.mxu1 %v5763_v4  ;;  %s4240_s27 = sshll.u32 %s7487_s16, 6  ;;  %v451_v32 = vld [vmem:[%s7443_s2 + $0x28] sm:$0xff]  ;;  %v453_v35 = vld [vmem:[%s7443_s2 + $0x38] sm:$0xff]  ;;  %v450_v38 = vld [vmem:[%s7443_s2 + $0x20] sm:$0xff] }
  0x11   : > { %4956 = vmatprep.subr.bf16.mxu1 %v7446_v3  ;;  %s5785_s30 = scalar_lea.vmem %s7441_s0, %s4240_s27  ;;  %v5818_v33 = vpack.c.bf16 %v451_v32, %v447_v31  ;;  %v5830_v37 = vpack.c.bf16 %v453_v35, %v449_v34  ;;  %v448_v39 = vld [vmem:[%s7443_s2 + $0x10] sm:$0xff]  ;;  %v5842_v41 = vpack.c.bf16 %v450_v38, %v446_v36  ;;  %v455_v44 = vld [vmem:[%s7443_s2 + $0x48] sm:$0xff]  ;;  %v457_v46 = vld [vmem:[%s7443_s2 + $0x58] sm:$0xff]  ;;  %s6258_s12 = scalar_lea.vmem %s7445_s4, %s4240_s27 }
  0x12   : > { %v198_v9 = vld [vmem:[%s5785_s30] sm:$0xff]  ;;  %v199_v10 = vld [vmem:[%s5785_s30 + $0x8] sm:$0xff]  ;;  %v200_v27 = vld [vmem:[%s5785_s30 + $0x10] sm:$0xff] }
  0x13   : > { %4853 = vmatprep.mubr.msk.f32.mxu0 %vm207_vm1, %v198_v9  ;;  %v201_v28 = vld [vmem:[%s5785_s30 + $0x18] sm:$0xff]  ;;  %v202_v29 = vld [vmem:[%s5785_s30 + $0x20] sm:$0xff]  ;;  %v203_v30 = vld [vmem:[%s5785_s30 + $0x28] sm:$0xff]  ;;  %4968 = vmatprep.subr.bf16.mxu0 %v5830_v37 }
  0x14   : > { %4958 = vmatpush3.bf16.msra.mxu1 %v5776_v8  ;;  %4854 = vmatmul.mubr.msk.f32.vlgmr.msra.gmra.mrb[0].mxu0 %vm207_vm1, %v199_v10  ;;  %v452_v40 = vld [vmem:[%s7443_s2 + $0x30] sm:$0xff]  ;;  %v459_v45 = vld [vmem:[%s7443_s2 + $0x68] sm:$0xff]  ;;  %v461_v47 = vld [vmem:[%s7443_s2 + $0x78] sm:$0xff] }
  0x15   : > { %4856 = vmatprep.mubr.msk.f32.mxu0 %vm207_vm1, %v200_v27  ;;  %4960 = vmatprep.subr.bf16.mxu1 %v5818_v33  ;;  %v5844_v42 = vpack.c.bf16 %v452_v40, %v448_v39  ;;  %v204_v43 = vld [vmem:[%s5785_s30 + $0x30] sm:$0xff]  ;;  %v5862_v48 = vpack.c.bf16 %v459_v45, %v455_v44  ;;  %v5864_v49 = vpack.c.bf16 %v461_v47, %v457_v46  ;;  %v454_v50 = vld [vmem:[%s7443_s2 + $0x40] sm:$0xff]  ;;  %v205_v53 = vld [vmem:[%s5785_s30 + $0x38] sm:$0xff] }
  0x16   : > { %v458_v51 = vld [vmem:[%s7443_s2 + $0x60] sm:$0xff]  ;;  %v456_v52 = vld [vmem:[%s7443_s2 + $0x50] sm:$0xff]  ;;  %v630_v59 = vld [vmem:[%s7444_s3 + $0x88] sm:$0xff] }
  0x17   : > { %4874 = vmatmul.mubr.f32.vlgmr.msra.gmra.mrb[0].mxu1 %v7448_v7  ;;  %4970 = vmatpush1.bf16.msra.mxu0 %v5844_v42  ;;  %v5878_v54 = vpack.c.bf16 %v458_v51, %v454_v50  ;;  %v460_v55 = vld [vmem:[%s7443_s2 + $0x70] sm:$0xff]  ;;  %v629_v58 = vld [vmem:[%s7444_s3 + $0x80] sm:$0xff]  ;;  %v662_v62 = vld [vmem:[%s7444_s3 + $0x188] sm:$0xff] }
  0x18   : > { %531 = vmatprep.mubr.f32.mxu1 %v7448_v7  ;;  %4857 = vmatmul.mubr.msk.f32.gmra.mrb[2].mxu0 %vm207_vm1, %v201_v28  ;;  %v5885_v56 = vpack.c.bf16 %v460_v55, %v456_v52  ;;  %v5898_v60 = vpack.c.bf16 %v630_v59, %v629_v58  ;;  %v661_v61 = vld [vmem:[%s7444_s3 + $0x180] sm:$0xff]  ;;  %v647_v28 = vld [vmem:[%s7444_s3 + $0x110] sm:$0xff]  ;;  %v634_v32 = vld [vmem:[%s7444_s3 + $0xa8] sm:$0xff] }
  0x19   : > { %4859 = vmatprep.mubr.msk.f32.mxu0 %vm207_vm1, %v202_v29  ;;  %4962 = vmatpush1.bf16.msra.mxu1 %v5842_v41  ;;  %v5906_v63 = vpack.c.bf16 %v662_v62, %v661_v61  ;;  %v648_v29 = vld [vmem:[%s7444_s3 + $0x118] sm:$0xff]  ;;  %v665_v34 = vld [vmem:[%s7444_s3 + $0x1a0] sm:$0xff]  ;;  %v666_v35 = vld [vmem:[%s7444_s3 + $0x1a8] sm:$0xff] }
  0x1a   : > { %4964 = vmatprep.subr.bf16.mxu1 %v5862_v48  ;;  %4972 = vmatprep.subr.bf16.mxu0 %v5864_v49  ;;  %v5993_v38 = vpack.c.bf16 %v648_v29, %v647_v28  ;;  %v617_v39 = vld [vmem:[%s7444_s3 + $0x20] sm:$0xff]  ;;  %v618_v40 = vld [vmem:[%s7444_s3 + $0x28] sm:$0xff]  ;;  %v6005_v44 = vpack.c.bf16 %v666_v35, %v665_v34  ;;  %v635_v47 = vld [vmem:[%s7444_s3 + $0xb0] sm:$0xff] }
  0x1b   : > { %4974 = vmatpush1.bf16.msra.mxu0 %v5885_v56  ;;  %v649_v45 = vld [vmem:[%s7444_s3 + $0x120] sm:$0xff]  ;;  %v650_v46 = vld [vmem:[%s7444_s3 + $0x128] sm:$0xff]  ;;  %v636_v50 = vld [vmem:[%s7444_s3 + $0xb8] sm:$0xff] }
  0x1c   : > { %4860 = vmatmul.mubr.msk.f32.gmra.mrb[4].mxu0 %vm207_vm1, %v203_v30  ;;  %5008 = vmatprep.subr.bf16.mxu0 %v5906_v63  ;;  %v633_v30 = vld [vmem:[%s7444_s3 + $0xa0] sm:$0xff]  ;;  %v667_v51 = vld [vmem:[%s7444_s3 + $0x1b0] sm:$0xff]  ;;  %v668_v52 = vld [vmem:[%s7444_s3 + $0x1b8] sm:$0xff]  ;;  %v6029_v55 = vpack.c.bf16 %v650_v46, %v649_v45  ;;  %v6039_v59 = vpack.c.bf16 %v636_v50, %v635_v47 }
  0x1d   : > { %4862 = vmatprep.mubr.msk.f32.mxu0 %vm207_vm1, %v204_v43  ;;  %4966 = vmatpush1.bf16.msra.mxu1 %v5878_v54  ;;  %v6003_v43 = vpack.c.bf16 %v634_v32, %v633_v30  ;;  %v620_v58 = vld [vmem:[%s7444_s3 + $0x38] sm:$0xff]  ;;  %v6041_v61 = vpack.c.bf16 %v668_v52, %v667_v51  ;;  %v651_v62 = vld [vmem:[%s7444_s3 + $0x130] sm:$0xff]  ;;  %v653_v28 = vld [vmem:[%s7444_s3 + $0x140] sm:$0xff] }
  0x1e   : > { %4976 = vmatprep.subr.bf16.mxu1 %v5898_v60  ;;  %v654_v29 = vld [vmem:[%s7444_s3 + $0x148] sm:$0xff]  ;;  %v639_v30 = vld [vmem:[%s7444_s3 + $0xd0] sm:$0xff]  ;;  %v640_v32 = vld [vmem:[%s7444_s3 + $0xd8] sm:$0xff] }
  0x1f   : > { %v671_v34 = vld [vmem:[%s7444_s3 + $0x1d0] sm:$0xff]  ;;  %v672_v35 = vld [vmem:[%s7444_s3 + $0x1d8] sm:$0xff]  ;;  %v6111_v47 = vpack.c.bf16 %v640_v32, %v639_v30  ;;  %v658_v30 = vld [vmem:[%s7444_s3 + $0x168] sm:$0xff] }
  0x20   : > { %4863 = vmatmul.mubr.msk.f32.gmra.mrb[6].mxu0 %vm207_vm1, %v205_v53  ;;  %v6027_v53 = vpack.c.bf16 %v618_v40, %v617_v39  ;;  %v6101_v40 = vpack.c.bf16 %v654_v29, %v653_v28  ;;  %v623_v45 = vld [vmem:[%s7444_s3 + $0x50] sm:$0xff]  ;;  %v624_v46 = vld [vmem:[%s7444_s3 + $0x58] sm:$0xff]  ;;  %v6113_v50 = vpack.c.bf16 %v672_v35, %v671_v34  ;;  %v657_v29 = vld [vmem:[%s7444_s3 + $0x160] sm:$0xff] }
  0x21   : > { %602 = vmatprep.mubr.f32.mxu0 %v7448_v7  ;;  %v655_v51 = vld [vmem:[%s7444_s3 + $0x150] sm:$0xff]  ;;  %v656_v52 = vld [vmem:[%s7444_s3 + $0x158] sm:$0xff]  ;;  %v6164_v32 = vpack.c.bf16 %v658_v30, %v657_v29  ;;  %v6208_v29 = vld [vmem:[%s7443_s2 + $0x80] sm:$0xff] }
  0x22   : > { %v643_v34 = vld [vmem:[%s7444_s3 + $0xf0] sm:$0xff]  ;;  %v644_v35 = vld [vmem:[%s7444_s3 + $0xf8] sm:$0xff] }
  0x23   : > { %v6213_v30 = vld [vmem:[%s7443_s2 + $0x90] sm:$0xff] }
  0xe7   : > { %v5794_v11 = vpop.f32.mrb[0].mxu0 }
  0xe8   : > { %v298_v12 = vpop.f32.mrb[1].mxu0 }
  0xea   : > { %v416_v13 = vpop.f32.mrb[0].mxu1 }
  0xeb   : > { %v420_v14 = vadd.f32 %v416_v13, %v298_v12  ;;  %v4875_v15 = vpop.f32.mrb[1].mxu1  ;;  %v5915_v2 = vpop.f32.mrb[2].mxu0  ;;  %v613_v13 = vld [vmem:[%s7444_s3] sm:$0xff] }
  0xec   : > { %7459 = vst [vmem:[#allocation3_spill] sm:$0xff] %v5915_v2  ;;  %v5917_v5 = vpop.f32.mrb[3].mxu0  ;;  %v645_v15 = vld [vmem:[%s7444_s3 + $0x100] sm:$0xff] }
  0xed   : > { %v4199_v16 = vmul.f32 -1.442695, %v420_v14  ;;  %7460 = vst [vmem:[#allocation4_spill] sm:$0xff] %v5917_v5  ;;  %v614_v14 = vld [vmem:[%s7444_s3 + $0x8] sm:$0xff] }
  0xef   : > { %5654 = vpow2.f32 %v4199_v16  ;;  %v5919_v6 = vpop.f32.mrb[4].mxu0  ;;  %v646_v16 = vld [vmem:[%s7444_s3 + $0x108] sm:$0xff] }
  0xf0   : > { %7461 = vst [vmem:[#allocation5_spill] sm:$0xff] %v5919_v6  ;;  %v5921_v9 = vpop.f32.mrb[5].mxu0 }
  0xf1   : > { %7462 = vst [vmem:[#allocation6_spill] sm:$0xff] %v5921_v9  ;;  %v7465_v9 = vmov 0.0  }
  0xf3   : > { %v5923_v10 = vpop.f32.mrb[6].mxu0 }
  0xf4   : > { %7463 = vst [vmem:[#allocation7_spill] sm:$0xff] %v5923_v10  ;;  %v5925_v12 = vpop.f32.mrb[7].mxu0 }
  0xf5   : > { %7464 = vst [vmem:[#allocation8_spill] sm:$0xff] %v5925_v12 }
  0xf9   : > { %v5655_v17 = vpop.eup %5654 }
  0xfa   : > { %v424_v18 = vadd.f32 1.0, %v5655_v17  ;;  %v631_v17 = vld [vmem:[%s7444_s3 + $0x90] sm:$0xff] }
  0xfc   : > { %5656 = vrcp.f32 %v424_v18  ;;  %v632_v18 = vld [vmem:[%s7444_s3 + $0x98] sm:$0xff] }
 0x106   : > { %v5796_v19 = vpop.eup %5656 }
 0x107   : > { %v427_v20 = vmul.f32 2.0, %v5796_v19  ;;  %v429_v24 = vmul.f32 0.0, %v5796_v19 }
 0x109   : > { %v4200_v21 = vadd.f32 -1.0, %v427_v20  ;;  %v664_v20 = vld [vmem:[%s7444_s3 + $0x198] sm:$0xff] }
 0x10b   : > { %431 = vrot.lane.b32.xlu0 %v4200_v21, %s5718_s5  ;;  %v5951_v21 = vpack.c.bf16 %v614_v14, %v613_v13  ;;  %v637_v13 = vld [vmem:[%s7444_s3 + $0xc0] sm:$0xff]  ;;  %v638_v14 = vld [vmem:[%s7444_s3 + $0xc8] sm:$0xff] }
 0x17d   : > { %v432_v22 = vpop.permute.xlu0 %431 }
 0x17e   : > { %v434_v23 = vmul.f32 %v5796_v19, %v432_v22  ;;  %v5953_v22 = vpack.c.bf16 %v646_v16, %v645_v15  ;;  %v669_v15 = vld [vmem:[%s7444_s3 + $0x1c0] sm:$0xff]  ;;  %v670_v16 = vld [vmem:[%s7444_s3 + $0x1c8] sm:$0xff] }
 0x180   : > { %436 = vrot.lane.b32.xlu0 %v434_v23, %s5719_s6  ;;  %v615_v23 = vld [vmem:[%s7444_s3 + $0x10] sm:$0xff] }
 0x1f2   : > { %v437_v25 = vpop.permute.xlu0 %436 }
 0x1f3   : > { %v5803_v26 = vadd.f32 %v437_v25, %v429_v24  ;;  %v616_v24 = vld [vmem:[%s7444_s3 + $0x18] sm:$0xff]  ;;  %v5961_v25 = vpack.c.bf16 %v632_v18, %v631_v17 }
 0x1f4   : > { %v5991_v36 = vpack.c.bf16 %v616_v24, %v615_v23  ;;  %v6075_v23 = vpack.c.bf16 %v638_v14, %v637_v13  ;;  %v6077_v24 = vpack.c.bf16 %v670_v16, %v669_v15  ;;  %v6135_v13 = vpack.c.bf16 %v624_v46, %v623_v45  ;;  %v625_v16 = vld [vmem:[%s7444_s3 + $0x60] sm:$0xff]  ;;  %v627_v46 = vld [vmem:[%s7444_s3 + $0x70] sm:$0xff] }
 0x1f5   : > { %5658 = vtanh.f32 %v5803_v26  ;;  %v6137_v14 = vpack.c.bf16 %v656_v52, %v655_v51  ;;  %v6173_v45 = vpack.c.bf16 %v644_v35, %v643_v34  ;;  %v628_v51 = vld [vmem:[%s7444_s3 + $0x78] sm:$0xff]  ;;  %v6218_v34 = vld [vmem:[%s7443_s2 + $0x88] sm:$0xff] }
 0x1f6   : > { %v6181_v52 = vpack.c.bf16 %v628_v51, %v627_v46  ;;  %v6223_v35 = vld [vmem:[%s7443_s2 + $0x98] sm:$0xff] }
 0x1ff   : > { %v5659_v57 = vpop.eup %5658 }
 0x200   : > { %442 = vrot.lane.b32.xlu1 %v5659_v57, %s5718_s5  ;;  %v619_v57 = vld [vmem:[%s7444_s3 + $0x30] sm:$0xff] }
 0x201   : > { %v6063_v17 = vpack.c.bf16 %v620_v58, %v619_v57  ;;  %v641_v57 = vld [vmem:[%s7444_s3 + $0xe0] sm:$0xff]  ;;  %v642_v58 = vld [vmem:[%s7444_s3 + $0xe8] sm:$0xff] }
 0x202   : > { %v6141_v15 = vpack.c.bf16 %v642_v58, %v641_v57  ;;  %v675_v57 = vld [vmem:[%s7444_s3 + $0x1f0] sm:$0xff]  ;;  %v676_v58 = vld [vmem:[%s7444_s3 + $0x1f8] sm:$0xff] }
 0x272   : > { %v443_v0 = vpop.permute.xlu1 %442 }
 0x273   : > { %v5911_v1 = vmul.f32 %v5796_v19, %v443_v0  ;;  %v663_v19 = vld [vmem:[%s7444_s3 + $0x190] sm:$0xff]  ;;  %v652_v0 = vld [vmem:[%s7444_s3 + $0x138] sm:$0xff] }
 0x274   : > { %v5963_v27 = vpack.c.bf16 %v664_v20, %v663_v19  ;;  %v6065_v18 = vpack.c.bf16 %v652_v0, %v651_v62  ;;  %v621_v19 = vld [vmem:[%s7444_s3 + $0x40] sm:$0xff]  ;;  %v622_v20 = vld [vmem:[%s7444_s3 + $0x48] sm:$0xff] }
 0x275   : > { %7458 = vst [vmem:[#allocation2_spill] sm:$0xff] %v5911_v1  ;;  %463 = vrot.lane.b32.xlu1 %v5911_v1, %s5719_s6  ;;  %v6099_v39 = vpack.c.bf16 %v622_v20, %v621_v19  ;;  %v673_v62 = vld [vmem:[%s7444_s3 + $0x1e0] sm:$0xff]  ;;  %v674_v0 = vld [vmem:[%s7444_s3 + $0x1e8] sm:$0xff] }
 0x276   : > { %v626_v19 = vld [vmem:[%s7444_s3 + $0x68] sm:$0xff]  ;;  %v6149_v20 = vpack.c.bf16 %v674_v0, %v673_v62  ;;  %v659_v62 = vld [vmem:[%s7444_s3 + $0x170] sm:$0xff]  ;;  %v660_v0 = vld [vmem:[%s7444_s3 + $0x178] sm:$0xff] }
 0x277   : > { %v6153_v28 = vpack.c.bf16 %v626_v19, %v625_v16  ;;  %v6197_v16 = vpack.c.bf16 %v676_v58, %v675_v57  ;;  %v6199_v19 = vpack.c.bf16 %v660_v0, %v659_v62 }
 0x2e7   : > { %v5974_v31 = vpop.permute.xlu1 %463 }
 0x2e8   : > { %4201 = vmatmul.mubr.msk.f32.vlgmr.msra.gmra.mrb[2].mxu1 %vm346_vm2, %v5974_v31  ;;  %4202 = vmatmul.mubr.msk.f32.vlgmr.msra.gmra.mrb[8].mxu0 %vm346_vm2, %v5974_v31 }
 0x2e9   : > { %4978 = vmatpush3.bf16.msra.mxu1 %v5951_v21  ;;  %5010 = vmatpush3.bf16.msra.mxu0 %v5953_v22 }
 0x2ea   : > { %4980 = vmatprep.subr.bf16.mxu1 %v5961_v25  ;;  %5012 = vmatprep.subr.bf16.mxu0 %v5963_v27 }
 0x2ed   : > { %4982 = vmatpush3.bf16.msra.mxu1 %v5991_v36  ;;  %5014 = vmatpush3.bf16.msra.mxu0 %v5993_v38 }
 0x2ee   : > { %4984 = vmatprep.subr.bf16.mxu1 %v6003_v43  ;;  %5016 = vmatprep.subr.bf16.mxu0 %v6005_v44 }
 0x2f1   : > { %4986 = vmatpush3.bf16.msra.mxu1 %v6027_v53  ;;  %5018 = vmatpush3.bf16.msra.mxu0 %v6029_v55 }
 0x2f2   : > { %4988 = vmatprep.subr.bf16.mxu1 %v6039_v59  ;;  %5020 = vmatprep.subr.bf16.mxu0 %v6041_v61 }
 0x2f5   : > { %4990 = vmatpush3.bf16.msra.mxu1 %v6063_v17  ;;  %5022 = vmatpush3.bf16.msra.mxu0 %v6065_v18 }
 0x2f6   : > { %4992 = vmatprep.subr.bf16.mxu1 %v6075_v23  ;;  %5024 = vmatprep.subr.bf16.mxu0 %v6077_v24 }
 0x2f9   : > { %4994 = vmatpush3.bf16.msra.mxu1 %v6099_v39  ;;  %5026 = vmatpush3.bf16.msra.mxu0 %v6101_v40 }
 0x2fa   : > { %4996 = vmatprep.subr.bf16.mxu1 %v6111_v47  ;;  %5028 = vmatprep.subr.bf16.mxu0 %v6113_v50 }
 0x2fd   : > { %4998 = vmatpush3.bf16.msra.mxu1 %v6135_v13  ;;  %5030 = vmatpush3.bf16.msra.mxu0 %v6137_v14 }
 0x2fe   : > { %5000 = vmatprep.subr.bf16.mxu1 %v6141_v15  ;;  %5032 = vmatprep.subr.bf16.mxu0 %v6149_v20 }
 0x301   : > { %5002 = vmatpush3.bf16.msra.mxu1 %v6153_v28  ;;  %5034 = vmatpush3.bf16.msra.mxu0 %v6164_v32 }
 0x302   : > { %5004 = vmatprep.subr.bf16.mxu1 %v6173_v45  ;;  %5036 = vmatprep.subr.bf16.mxu0 %v6197_v16 }
 0x305   : > { %5006 = vmatpush3.bf16.msra.mxu1 %v6181_v52  ;;  %5038 = vmatpush3.bf16.msra.mxu0 %v6199_v19 }
 0x306   : > { %5039 = vmatprep.subr.bf16.mxu1 %v7446_v3  ;;  %5046 = vmatprep.subr.bf16.mxu0 %v5818_v33 }
 0x3bb   : > { %v533_v46 = vpop.f32.mrb[2].mxu1  ;;  %v604_v51 = vpop.f32.mrb[8].mxu0 }
 0x3bc   : > { %v534_v57 = vadd.f32 %v533_v46, %v6208_v29  ;;  %v605_v58 = vadd.f32 %v604_v51, %v6213_v30  ;;  %v535_v62 = vpop.f32.mrb[3].mxu1  ;;  %v606_v0 = vpop.f32.mrb[9].mxu0  ;;  %v7466_v46 = vmov 0.0|0.0  }
 0x3bd   : > { %v536_v3 = vadd.f32 %v535_v62, %v6218_v34  ;;  %v607_v7 = vadd.f32 %v606_v0, %v6223_v35 }
 0x3be   : > { %v609_v12 = vmax.f32 %v534_v57, 0.0  ;;  %v611_v6 = vmax.f32 %v605_v58, 0.0 }
 0x3bf   : > { %v610_v1 = vmax.f32 %v536_v3, 0.0  ;;  %v612_v10 = vmax.f32 %v607_v7, 0.0 }
 0x3c1   : > { %741 = vmatprep.mubr.f32.mxu1 %v610_v1  ;;  %811 = vmatprep.mubr.f32.mxu0 %v612_v10  ;;  %v6250_v1 = vld [vmem:[%s7444_s3 + $0x200] sm:$0xff] }
 0x3c2   : > { %742 = vmatmul.mubr.f32.vlgmr.msra.gmra.mrb[4].mxu1 %v609_v12  ;;  %812 = vmatmul.mubr.f32.vlgmr.msra.gmra.mrb[10].mxu0 %v611_v6  ;;  %7467 = vst [vmem:[#allocation9_spill] sm:$0xff] %v6250_v1 }
 0x3c3   : > { %5041 = vmatpush3.bf16.msra.mxu1 %v5763_v4  ;;  %4884 = vmatprep.mubr.msk.f32.mxu1 %vm5716_vm0, %v7465_v9 }
 0x3c4   : > { %5042 = vmatprep.subr.bf16.mxu1 %v7466_v46  ;;  %5048 = vmatpush1.bf16.msra.mxu0 %v5842_v41 }
 0x3c5   : > { %5050 = vmatprep.subr.bf16.mxu0 %v5862_v48  ;;  %1004 = vmatprep.mubr.f32.mxu0 %v7465_v9 }
 0x3c7   : > { %5044 = vmatpush3.bf16.msra.mxu1 %v5776_v8 }
 0x3c8   : > { %5054 = vmatprep.subr.bf16.mxu1 %v5830_v37  ;;  %5052 = vmatpush1.bf16.msra.mxu0 %v5878_v54 }
 0x3c9   : > { %5062 = vmatprep.subr.bf16.mxu0 %v5898_v60 }
 0x3ca   : > { %4885 = vmatmul.mubr.msk.f32.vlgmr.msra.gmra.mrb[6].mxu1 %vm346_vm2, %v5974_v31 }
 0x3cb   : > { %5056 = vmatpush1.bf16.msra.mxu1 %v5844_v42  ;;  %1075 = vmatprep.mubr.f32.mxu1 %v7465_v9 }
 0x3cc   : > { %5058 = vmatprep.subr.bf16.mxu1 %v5864_v49 }
 0x3cf   : > { %5060 = vmatpush1.bf16.msra.mxu1 %v5885_v56 }
 0x3d0   : > { %5094 = vmatprep.subr.bf16.mxu1 %v5906_v63 }
 0x495   : > { %v4288_v3 = vpop.f32.mrb[4].mxu1  ;;  %v4323_v7 = vpop.f32.mrb[10].mxu0 }
 0x496   : > { %v4289_v6 = vpop.f32.mrb[5].mxu1  ;;  %v4324_v10 = vpop.f32.mrb[11].mxu0 }
 0x497   : > { %v4290_v12 = vadd.f32 %v4289_v6, %v4288_v3  ;;  %v4325_v31 = vadd.f32 %v4324_v10, %v4323_v7 }
 0x499   : > { %v744_v51 = vadd.f32 %v4290_v12, %v6250_v1 }
 0x49b   : > { %v814_v57 = vadd.f32 %v4325_v31, %v744_v51 }
 0x49d   : > { %817 = vst.msk [vmem:[%s6258_s12] sm:$0xff] %vm346_vm2, %v814_v57  ;;  %v889_v58 = vpop.f32.mrb[6].mxu1 }
 0x49e   : > { %v893_v62 = vadd.f32 %v5794_v11, %v889_v58  ;;  %v4886_v0 = vpop.f32.mrb[7].mxu1 }
 0x4a0   : > { %v4204_v2 = vmul.f32 -1.442695, %v893_v62 }
 0x4a2   : > { %5660 = vpow2.f32 %v4204_v2 }
 0x4ac   : > { %v5661_v3 = vpop.eup %5660 }
 0x4ad   : > { %v897_v7 = vadd.f32 1.0, %v5661_v3 }
 0x4af   : > { %5662 = vrcp.f32 %v897_v7 }
 0x4b9   : > { %v5663_v6 = vpop.eup %5662 }
 0x4ba   : > { %v900_v10 = vmul.f32 2.0, %v5663_v6  ;;  %v902_v31 = vmul.f32 %v5663_v6, %v5803_v26 }
 0x4bc   : > { %v4205_v12 = vadd.f32 -1.0, %v900_v10 }
 0x4be   : > { %904 = vrot.lane.b32.xlu0 %v4205_v12, %s5718_s5 }
 0x530   : > { %v905_v5 = vpop.permute.xlu0 %904 }
 0x531   : > { %v907_v1 = vmul.f32 %v5663_v6, %v905_v5 }
 0x533   : > { %909 = vrot.lane.b32.xlu1 %v907_v1, %s5719_s6 }
 0x5a5   : > { %v910_v51 = vpop.permute.xlu1 %909 }
 0x5a6   : > { %v6266_v57 = vadd.f32 %v910_v51, %v902_v31 }
 0x5a8   : > { %5664 = vtanh.f32 %v6266_v57 }
 0x5b2   : > { %v5665_v11 = vpop.eup %5664 }
 0x5b3   : > { %915 = vrot.lane.b32.xlu0 %v5665_v11, %s5718_s5 }
 0x625   : > { %v916_v2 = vpop.permute.xlu0 %915 }
 0x626   : > { %v6270_v58 = vmul.f32 %v5663_v6, %v916_v2 }
 0x628   : > { %7468 = vst [vmem:[#allocation10_spill] sm:$0xff] %v6270_v58  ;;  %936 = vrot.lane.b32.xlu1 %v6270_v58, %s5719_s6 }
 0x69a   : > { %v937_v62 = vpop.permute.xlu1 %936 }
 0x69b   : > { %4206 = vmatmul.mubr.msk.f32.vlgmr.msra.gmra.mrb[12].mxu0 %vm346_vm2, %v937_v62  ;;  %4207 = vmatmul.mubr.msk.f32.vlgmr.msra.gmra.mrb[8].mxu1 %vm346_vm2, %v937_v62 }
 0x69c   : > { %5064 = vmatpush3.bf16.msra.mxu0 %v5951_v21  ;;  %5096 = vmatpush3.bf16.msra.mxu1 %v5953_v22 }
 0x69d   : > { %5066 = vmatprep.subr.bf16.mxu0 %v5961_v25  ;;  %5098 = vmatprep.subr.bf16.mxu1 %v5963_v27 }
 0x6a0   : > { %5068 = vmatpush3.bf16.msra.mxu0 %v5991_v36  ;;  %5100 = vmatpush3.bf16.msra.mxu1 %v5993_v38 }
 0x6a1   : > { %5070 = vmatprep.subr.bf16.mxu0 %v6003_v43  ;;  %5102 = vmatprep.subr.bf16.mxu1 %v6005_v44 }
 0x6a4   : > { %5072 = vmatpush3.bf16.msra.mxu0 %v6027_v53  ;;  %5104 = vmatpush3.bf16.msra.mxu1 %v6029_v55 }
 0x6a5   : > { %5074 = vmatprep.subr.bf16.mxu0 %v6039_v59  ;;  %5106 = vmatprep.subr.bf16.mxu1 %v6041_v61 }
 0x6a8   : > { %5076 = vmatpush3.bf16.msra.mxu0 %v6063_v17  ;;  %5108 = vmatpush3.bf16.msra.mxu1 %v6065_v18 }
 0x6a9   : > { %5078 = vmatprep.subr.bf16.mxu0 %v6075_v23  ;;  %5110 = vmatprep.subr.bf16.mxu1 %v6077_v24 }
 0x6ac   : > { %5080 = vmatpush3.bf16.msra.mxu0 %v6099_v39  ;;  %5112 = vmatpush3.bf16.msra.mxu1 %v6101_v40 }
 0x6ad   : > { %5082 = vmatprep.subr.bf16.mxu0 %v6111_v47  ;;  %5114 = vmatprep.subr.bf16.mxu1 %v6113_v50 }
 0x6b0   : > { %5084 = vmatpush3.bf16.msra.mxu0 %v6135_v13  ;;  %5116 = vmatpush3.bf16.msra.mxu1 %v6137_v14 }
 0x6b1   : > { %5086 = vmatprep.subr.bf16.mxu0 %v6141_v15  ;;  %5118 = vmatprep.subr.bf16.mxu1 %v6149_v20 }
 0x6b4   : > { %5088 = vmatpush3.bf16.msra.mxu0 %v6153_v28  ;;  %5120 = vmatpush3.bf16.msra.mxu1 %v6164_v32 }
 0x6b5   : > { %5090 = vmatprep.subr.bf16.mxu0 %v6173_v45  ;;  %5122 = vmatprep.subr.bf16.mxu1 %v6197_v16 }
 0x6b8   : > { %5092 = vmatpush3.bf16.msra.mxu0 %v6181_v52  ;;  %5124 = vmatpush3.bf16.msra.mxu1 %v6199_v19 }
 0x6b9   : > { %5125 = vmatprep.subr.bf16.mxu0 %v7466_v46  ;;  %5132 = vmatprep.subr.bf16.mxu1 %v5818_v33 }
 0x76e   : > { %v1006_v26 = vpop.f32.mrb[12].mxu0  ;;  %v1077_v5 = vpop.f32.mrb[8].mxu1 }
 0x76f   : > { %v1007_v1 = vadd.f32 %v1006_v26, %v6208_v29  ;;  %v1078_v0 = vadd.f32 %v1077_v5, %v6213_v30  ;;  %v1008_v3 = vpop.f32.mrb[13].mxu0  ;;  %v1079_v7 = vpop.f32.mrb[9].mxu1  ;;  %v7469_v26 = vld [vmem:[#allocation9_spill] sm:$0xff] }
 0x770   : > { %v1009_v6 = vadd.f32 %v1008_v3, %v6218_v34  ;;  %v1080_v10 = vadd.f32 %v1079_v7, %v6223_v35 }
 0x771   : > { %v1082_v51 = vmax.f32 %v1007_v1, 0.0  ;;  %v1084_v11 = vmax.f32 %v1078_v0, 0.0 }
 0x772   : > { %v1083_v12 = vmax.f32 %v1009_v6, 0.0  ;;  %v1085_v31 = vmax.f32 %v1080_v10, 0.0 }
 0x774   : > { %1214 = vmatprep.mubr.f32.mxu0 %v1083_v12  ;;  %1284 = vmatprep.mubr.f32.mxu1 %v1085_v31 }
 0x775   : > { %1215 = vmatmul.mubr.f32.vlgmr.msra.gmra.mrb[14].mxu0 %v1082_v51  ;;  %1285 = vmatmul.mubr.f32.vlgmr.msra.gmra.mrb[10].mxu1 %v1084_v11 }
 0x776   : > { %5127 = vmatpush3.bf16.msra.mxu0 %v5763_v4  ;;  %4895 = vmatprep.mubr.msk.f32.mxu0 %vm5716_vm0, %v7465_v9 }
 0x777   : > { %5128 = vmatprep.subr.bf16.mxu0 %v7466_v46  ;;  %5134 = vmatpush1.bf16.msra.mxu1 %v5842_v41 }
 0x778   : > { %5136 = vmatprep.subr.bf16.mxu1 %v5862_v48  ;;  %1476 = vmatprep.mubr.f32.mxu1 %v7465_v9 }
 0x77a   : > { %5130 = vmatpush3.bf16.msra.mxu0 %v5776_v8 }
 0x77b   : > { %5140 = vmatprep.subr.bf16.mxu0 %v5830_v37  ;;  %5138 = vmatpush1.bf16.msra.mxu1 %v5878_v54 }
 0x77c   : > { %5148 = vmatprep.subr.bf16.mxu1 %v5898_v60 }
 0x77d   : > { %4896 = vmatmul.mubr.msk.f32.vlgmr.msra.gmra.mrb[16].mxu0 %vm346_vm2, %v937_v62  ;;  %v7470_v62 = vld [vmem:[#allocation4_spill] sm:$0xff] }
 0x77e   : > { %5142 = vmatpush1.bf16.msra.mxu0 %v5844_v42  ;;  %1547 = vmatprep.mubr.f32.mxu0 %v7465_v9 }
 0x77f   : > { %5144 = vmatprep.subr.bf16.mxu0 %v5864_v49 }
 0x782   : > { %5146 = vmatpush1.bf16.msra.mxu0 %v5885_v56 }
 0x783   : > { %5180 = vmatprep.subr.bf16.mxu0 %v5906_v63 }
 0x848   : > { %v4363_v33 = vpop.f32.mrb[14].mxu0  ;;  %v4398_v41 = vpop.f32.mrb[10].mxu1 }
 0x849   : > { %v4364_v37 = vpop.f32.mrb[15].mxu0  ;;  %v4399_v48 = vpop.f32.mrb[11].mxu1 }
 0x84a   : > { %v4365_v54 = vadd.f32 %v4364_v37, %v4363_v33  ;;  %v4400_v2 = vadd.f32 %v4399_v48, %v4398_v41 }
 0x84c   : > { %v1217_v60 = vadd.f32 %v4365_v54, %v7469_v26 }
 0x84e   : > { %v1287_v5 = vadd.f32 %v4400_v2, %v1217_v60 }
 0x850   : > { %1290 = vst.msk [vmem:[%s6258_s12 + $0x8] sm:$0xff] %vm346_vm2, %v1287_v5  ;;  %v1361_v42 = vpop.f32.mrb[16].mxu0 }
 0x851   : > { %v1365_v1 = vadd.f32 %v1361_v42, %v7470_v62  ;;  %v4897_v0 = vpop.f32.mrb[17].mxu0  ;;  %v1864_v42 = vld [vmem:[%s7443_s2 + $0x8] sm:$0xff] }
 0x852   : > { %v1868_v62 = vld [vmem:[%s7443_s2 + $0x28] sm:$0xff] }
 0x853   : > { %v4209_v49 = vmul.f32 -1.442695, %v1365_v1  ;;  %v1866_v1 = vld [vmem:[%s7443_s2 + $0x18] sm:$0xff]  ;;  %v6408_v0 = vpack.c.bf16 %v1868_v62, %v1864_v42  ;;  %v2082_v42 = vld [vmem:[%s7444_s3 + $0x1a0] sm:$0xff]  ;;  %v2083_v62 = vld [vmem:[%s7444_s3 + $0x1a8] sm:$0xff] }
 0x855   : > { %5666 = vpow2.f32 %v4209_v49  ;;  %v1870_v49 = vld [vmem:[%s7443_s2 + $0x38] sm:$0xff] }
 0x85f   : > { %v5667_v56 = vpop.eup %5666 }
 0x860   : > { %v1369_v3 = vadd.f32 1.0, %v5667_v56  ;;  %v1863_v56 = vld [vmem:[%s7443_s2] sm:$0xff] }
 0x862   : > { %5668 = vrcp.f32 %v1369_v3  ;;  %v1867_v3 = vld [vmem:[%s7443_s2 + $0x20] sm:$0xff] }
 0x86c   : > { %v5669_v63 = vpop.eup %5668 }
 0x86d   : > { %v1372_v7 = vmul.f32 2.0, %v5669_v63  ;;  %v1374_v31 = vmul.f32 %v5669_v63, %v6266_v57 }
 0x86f   : > { %v4210_v6 = vadd.f32 -1.0, %v1372_v7  ;;  %v6421_v7 = vpack.c.bf16 %v1867_v3, %v1863_v56  ;;  %v2034_v56 = vld [vmem:[%s7444_s3 + $0x20] sm:$0xff]  ;;  %v2035_v3 = vld [vmem:[%s7444_s3 + $0x28] sm:$0xff] }
 0x871   : > { %1376 = vrot.lane.b32.xlu0 %v4210_v6, %s5718_s5  ;;  %v1865_v6 = vld [vmem:[%s7443_s2 + $0x10] sm:$0xff] }
 0x8e3   : > { %v1377_v10 = vpop.permute.xlu0 %1376 }
 0x8e4   : > { %v1379_v12 = vmul.f32 %v5669_v63, %v1377_v10  ;;  %v1869_v10 = vld [vmem:[%s7443_s2 + $0x30] sm:$0xff] }
 0x8e6   : > { %1381 = vrot.lane.b32.xlu1 %v1379_v12, %s5719_s6  ;;  %v1872_v12 = vld [vmem:[%s7443_s2 + $0x48] sm:$0xff] }
 0x958   : > { %v1382_v51 = vpop.permute.xlu1 %1381 }
 0x959   : > { %v6336_v11 = vadd.f32 %v1382_v51, %v1374_v31  ;;  %v6433_v31 = vpack.c.bf16 %v1869_v10, %v1865_v6  ;;  %v1876_v51 = vld [vmem:[%s7443_s2 + $0x68] sm:$0xff]  ;;  %v6572_v10 = vpack.c.bf16 %v2083_v62, %v2082_v42  ;;  %v2088_v42 = vld [vmem:[%s7444_s3 + $0x1d0] sm:$0xff]  ;;  %v2089_v62 = vld [vmem:[%s7444_s3 + $0x1d8] sm:$0xff] }
 0x95b   : > { %5670 = vtanh.f32 %v6336_v11 }
 0x965   : > { %v5671_v33 = vpop.eup %5670 }
 0x966   : > { %1387 = vrot.lane.b32.xlu0 %v5671_v33, %s5718_s5  ;;  %v1878_v33 = vld [vmem:[%s7443_s2 + $0x78] sm:$0xff] }
 0x9d8   : > { %v1388_v41 = vpop.permute.xlu0 %1387 }
 0x9d9   : > { %v6340_v37 = vmul.f32 %v5669_v63, %v1388_v41  ;;  %v6419_v63 = vpack.c.bf16 %v1870_v49, %v1866_v1  ;;  %v6446_v41 = vpack.c.bf16 %v1876_v51, %v1872_v12  ;;  %v2066_v12 = vld [vmem:[%s7444_s3 + $0x120] sm:$0xff]  ;;  %v2067_v51 = vld [vmem:[%s7444_s3 + $0x128] sm:$0xff] }
 0x9db   : > { %7471 = vst [vmem:[#allocation9_spill] sm:$0xff] %v6340_v37  ;;  %1408 = vrot.lane.b32.xlu1 %v6340_v37, %s5719_s6 }
 0xa4d   : > { %v1409_v48 = vpop.permute.xlu1 %1408 }
 0xa4e   : > { %4211 = vmatmul.mubr.msk.f32.vlgmr.msra.gmra.mrb[12].mxu1 %vm346_vm2, %v1409_v48  ;;  %4212 = vmatmul.mubr.msk.f32.vlgmr.msra.gmra.mrb[18].mxu0 %vm346_vm2, %v1409_v48 }
 0xa4f   : > { %5150 = vmatpush3.bf16.msra.mxu1 %v5951_v21  ;;  %5182 = vmatpush3.bf16.msra.mxu0 %v5953_v22 }
 0xa50   : > { %5152 = vmatprep.subr.bf16.mxu1 %v5961_v25  ;;  %5184 = vmatprep.subr.bf16.mxu0 %v5963_v27 }
 0xa53   : > { %5154 = vmatpush3.bf16.msra.mxu1 %v5991_v36  ;;  %5186 = vmatpush3.bf16.msra.mxu0 %v5993_v38 }
 0xa54   : > { %5156 = vmatprep.subr.bf16.mxu1 %v6003_v43  ;;  %5188 = vmatprep.subr.bf16.mxu0 %v6005_v44 }
 0xa57   : > { %5158 = vmatpush3.bf16.msra.mxu1 %v6027_v53  ;;  %5190 = vmatpush3.bf16.msra.mxu0 %v6029_v55 }
 0xa58   : > { %5160 = vmatprep.subr.bf16.mxu1 %v6039_v59  ;;  %5192 = vmatprep.subr.bf16.mxu0 %v6041_v61 }
 0xa5b   : > { %5162 = vmatpush3.bf16.msra.mxu1 %v6063_v17  ;;  %5194 = vmatpush3.bf16.msra.mxu0 %v6065_v18 }
 0xa5c   : > { %5164 = vmatprep.subr.bf16.mxu1 %v6075_v23  ;;  %5196 = vmatprep.subr.bf16.mxu0 %v6077_v24 }
 0xa5f   : > { %5166 = vmatpush3.bf16.msra.mxu1 %v6099_v39  ;;  %5198 = vmatpush3.bf16.msra.mxu0 %v6101_v40 }
 0xa60   : > { %5168 = vmatprep.subr.bf16.mxu1 %v6111_v47  ;;  %5200 = vmatprep.subr.bf16.mxu0 %v6113_v50 }
 0xa63   : > { %5170 = vmatpush3.bf16.msra.mxu1 %v6135_v13  ;;  %5202 = vmatpush3.bf16.msra.mxu0 %v6137_v14  ;;  %v7472_v14 = vld [vmem:[#allocation3_spill] sm:$0xff] }
 0xa64   : > { %5172 = vmatprep.subr.bf16.mxu1 %v6141_v15  ;;  %5204 = vmatprep.subr.bf16.mxu0 %v6149_v20 }
 0xa67   : > { %5174 = vmatpush3.bf16.msra.mxu1 %v6153_v28  ;;  %5206 = vmatpush3.bf16.msra.mxu0 %v6164_v32 }
 0xa68   : > { %5176 = vmatprep.subr.bf16.mxu1 %v6173_v45  ;;  %5208 = vmatprep.subr.bf16.mxu0 %v6197_v16 }
 0xa6b   : > { %5178 = vmatpush3.bf16.msra.mxu1 %v6181_v52  ;;  %5210 = vmatpush3.bf16.msra.mxu0 %v6199_v19 }
 0xa6c   : > { %5211 = vmatprep.subr.bf16.mxu1 %v7466_v46  ;;  %5218 = vmatprep.subr.bf16.mxu0 %v6408_v0 }
 0xb21   : > { %v1478_v21 = vpop.f32.mrb[12].mxu1  ;;  %v1549_v22 = vpop.f32.mrb[18].mxu0 }
 0xb22   : > { %v1479_v25 = vadd.f32 %v1478_v21, %v6208_v29  ;;  %v1550_v27 = vadd.f32 %v1549_v22, %v6213_v30  ;;  %v1480_v36 = vpop.f32.mrb[13].mxu1  ;;  %v1551_v38 = vpop.f32.mrb[19].mxu0  ;;  %v1871_v21 = vld [vmem:[%s7443_s2 + $0x40] sm:$0xff] }
 0xb23   : > { %v1481_v43 = vadd.f32 %v1480_v36, %v6218_v34  ;;  %v1552_v44 = vadd.f32 %v1551_v38, %v6223_v35  ;;  %v1875_v22 = vld [vmem:[%s7443_s2 + $0x60] sm:$0xff]  ;;  %v1877_v36 = vld [vmem:[%s7443_s2 + $0x70] sm:$0xff] }
 0xb24   : > { %v1554_v59 = vmax.f32 %v1479_v25, 0.0  ;;  %v1556_v61 = vmax.f32 %v1550_v27, 0.0  ;;  %v1873_v25 = vld [vmem:[%s7443_s2 + $0x50] sm:$0xff]  ;;  %v6460_v27 = vpack.c.bf16 %v1875_v22, %v1871_v21  ;;  %v2085_v22 = vld [vmem:[%s7444_s3 + $0x1b8] sm:$0xff] }
 0xb25   : > { %v1555_v53 = vmax.f32 %v1481_v43, 0.0  ;;  %v1557_v55 = vmax.f32 %v1552_v44, 0.0  ;;  %v6467_v38 = vpack.c.bf16 %v1877_v36, %v1873_v25  ;;  %v2046_v44 = vld [vmem:[%s7444_s3 + $0x80] sm:$0xff]  ;;  %v2084_v21 = vld [vmem:[%s7444_s3 + $0x1b0] sm:$0xff]  ;;  %v6594_v25 = vpack.c.bf16 %v2035_v3, %v2034_v56 }
 0xb26   : > { %v6596_v36 = vpack.c.bf16 %v2067_v51, %v2066_v12  ;;  %v2040_v12 = vld [vmem:[%s7444_s3 + $0x50] sm:$0xff]  ;;  %v2041_v51 = vld [vmem:[%s7444_s3 + $0x58] sm:$0xff] }
 0xb27   : > { %1686 = vmatprep.mubr.f32.mxu1 %v1555_v53  ;;  %1756 = vmatprep.mubr.f32.mxu0 %v1557_v55  ;;  %v2047_v53 = vld [vmem:[%s7444_s3 + $0x88] sm:$0xff] }
 0xb28   : > { %1687 = vmatmul.mubr.f32.vlgmr.msra.gmra.mrb[14].mxu1 %v1554_v59  ;;  %1757 = vmatmul.mubr.f32.vlgmr.msra.gmra.mrb[20].mxu0 %v1556_v61  ;;  %v6478_v55 = vpack.c.bf16 %v2047_v53, %v2046_v44  ;;  %v2078_v59 = vld [vmem:[%s7444_s3 + $0x180] sm:$0xff]  ;;  %v2079_v61 = vld [vmem:[%s7444_s3 + $0x188] sm:$0xff]  ;;  %v2037_v44 = vld [vmem:[%s7444_s3 + $0x38] sm:$0xff] }
 0xb29   : > { %5213 = vmatpush3.bf16.msra.mxu1 %v5763_v4  ;;  %4906 = vmatprep.mubr.msk.f32.mxu1 %vm5716_vm0, %v7465_v9 }
 0xb2a   : > { %5214 = vmatprep.subr.bf16.mxu1 %v7466_v46  ;;  %1948 = vmatprep.mubr.f32.mxu0 %v7465_v9 }
 0xb2b   : > { %5220 = vmatpush1.bf16.msra.mxu0 %v6421_v7 }
 0xb2c   : > { %5222 = vmatprep.subr.bf16.mxu0 %v6446_v41 }
 0xb2d   : > { %5216 = vmatpush3.bf16.msra.mxu1 %v5776_v8 }
 0xb2e   : > { %5226 = vmatprep.subr.bf16.mxu1 %v6419_v63 }
 0xb2f   : > { %5224 = vmatpush1.bf16.msra.mxu0 %v6460_v27 }
 0xb30   : > { %4907 = vmatmul.mubr.msk.f32.vlgmr.msra.gmra.mrb[16].mxu1 %vm346_vm2, %v1409_v48  ;;  %5234 = vmatprep.subr.bf16.mxu0 %v6478_v55 }
 0xb31   : > { %2019 = vmatprep.mubr.f32.mxu1 %v7465_v9  ;;  %5228 = vmatpush1.bf16.msra.mxu1 %v6433_v31 }
 0xbfb   : > { %v4438_v17 = vpop.f32.mrb[14].mxu1  ;;  %v4473_v18 = vpop.f32.mrb[20].mxu0 }
 0xbfc   : > { %v4439_v23 = vpop.f32.mrb[15].mxu1  ;;  %v4474_v24 = vpop.f32.mrb[21].mxu0 }
 0xbfd   : > { %v4440_v39 = vadd.f32 %v4439_v23, %v4438_v17  ;;  %v4475_v40 = vadd.f32 %v4474_v24, %v4473_v18  ;;  %v6486_v17 = vpack.c.bf16 %v2079_v61, %v2078_v59  ;;  %v2030_v24 = vld [vmem:[%s7444_s3] sm:$0xff]  ;;  %v6608_v59 = vpack.c.bf16 %v2085_v22, %v2084_v21  ;;  %v2068_v61 = vld [vmem:[%s7444_s3 + $0x130] sm:$0xff]  ;;  %v2073_v22 = vld [vmem:[%s7444_s3 + $0x158] sm:$0xff] }
 0xbfe   : > { %v2072_v21 = vld [vmem:[%s7444_s3 + $0x150] sm:$0xff] }
 0xbff   : > { %v1689_v47 = vadd.f32 %v4440_v39, %v7469_v26  ;;  %v2031_v39 = vld [vmem:[%s7444_s3 + $0x8] sm:$0xff] }
 0xc01   : > { %v1759_v50 = vadd.f32 %v4475_v40, %v1689_v47  ;;  %v2062_v40 = vld [vmem:[%s7444_s3 + $0x100] sm:$0xff]  ;;  %v2063_v47 = vld [vmem:[%s7444_s3 + $0x108] sm:$0xff] }
 0xc03   : > { %1762 = vst.msk [vmem:[%s6258_s12 + $0x10] sm:$0xff] %vm346_vm2, %v1759_v50  ;;  %v1833_v13 = vpop.f32.mrb[16].mxu1  ;;  %v2048_v50 = vld [vmem:[%s7444_s3 + $0x90] sm:$0xff] }
 0xc04   : > { %v1837_v15 = vadd.f32 %v7472_v14, %v1833_v13  ;;  %v4908_v20 = vpop.f32.mrb[17].mxu1  ;;  %v2049_v13 = vld [vmem:[%s7444_s3 + $0x98] sm:$0xff]  ;;  %v2080_v14 = vld [vmem:[%s7444_s3 + $0x190] sm:$0xff] }
 0xc05   : > { %v6518_v20 = vpack.c.bf16 %v2031_v39, %v2030_v24  ;;  %v2054_v24 = vld [vmem:[%s7444_s3 + $0xc0] sm:$0xff]  ;;  %v2055_v39 = vld [vmem:[%s7444_s3 + $0xc8] sm:$0xff] }
 0xc06   : > { %v4214_v28 = vmul.f32 -1.442695, %v1837_v15  ;;  %v2081_v15 = vld [vmem:[%s7444_s3 + $0x198] sm:$0xff] }
 0xc08   : > { %5672 = vpow2.f32 %v4214_v28  ;;  %v6520_v28 = vpack.c.bf16 %v2063_v47, %v2062_v40  ;;  %v2086_v40 = vld [vmem:[%s7444_s3 + $0x1c0] sm:$0xff]  ;;  %v2087_v47 = vld [vmem:[%s7444_s3 + $0x1c8] sm:$0xff] }
 0xc12   : > { %v5673_v32 = vpop.eup %5672 }
 0xc13   : > { %v1841_v45 = vadd.f32 1.0, %v5673_v32  ;;  %v2032_v32 = vld [vmem:[%s7444_s3 + $0x10] sm:$0xff] }
 0xc15   : > { %5674 = vrcp.f32 %v1841_v45  ;;  %v2033_v45 = vld [vmem:[%s7444_s3 + $0x18] sm:$0xff] }
 0xc16   : > { %v6558_v1 = vpack.c.bf16 %v2033_v45, %v2032_v32  ;;  %v6642_v32 = vpack.c.bf16 %v2055_v39, %v2054_v24  ;;  %v6644_v45 = vpack.c.bf16 %v2087_v47, %v2086_v40  ;;  %v6702_v24 = vpack.c.bf16 %v2041_v51, %v2040_v12  ;;  %v2042_v47 = vld [vmem:[%s7444_s3 + $0x60] sm:$0xff]  ;;  %v2044_v51 = vld [vmem:[%s7444_s3 + $0x70] sm:$0xff] }
 0xc17   : > { %v6704_v39 = vpack.c.bf16 %v2073_v22, %v2072_v21  ;;  %v2045_v21 = vld [vmem:[%s7444_s3 + $0x78] sm:$0xff]  ;;  %v2092_v22 = vld [vmem:[%s7444_s3 + $0x1f0] sm:$0xff] }
 0xc1f   : > { %v5675_v52 = vpop.eup %5674 }
 0xc20   : > { %v1844_v16 = vmul.f32 2.0, %v5675_v52  ;;  %v1846_v2 = vmul.f32 %v5675_v52, %v6336_v11  ;;  %v1874_v11 = vld [vmem:[%s7443_s2 + $0x58] sm:$0xff] }
 0xc21   : > { %v6448_v48 = vpack.c.bf16 %v1878_v33, %v1874_v11  ;;  %v2052_v11 = vld [vmem:[%s7444_s3 + $0xb0] sm:$0xff]  ;;  %v2053_v33 = vld [vmem:[%s7444_s3 + $0xb8] sm:$0xff] }
 0xc22   : > { %v4215_v19 = vadd.f32 -1.0, %v1844_v16  ;;  %v6530_v16 = vpack.c.bf16 %v2081_v15, %v2080_v14  ;;  %v6606_v53 = vpack.c.bf16 %v2053_v33, %v2052_v11  ;;  %v2038_v14 = vld [vmem:[%s7444_s3 + $0x40] sm:$0xff]  ;;  %v2039_v15 = vld [vmem:[%s7444_s3 + $0x48] sm:$0xff]  ;;  %v6680_v33 = vpack.c.bf16 %v2089_v62, %v2088_v42  ;;  %v2060_v42 = vld [vmem:[%s7444_s3 + $0xf0] sm:$0xff] }
 0xc23   : > { %5230 = vmatprep.subr.bf16.mxu1 %v6448_v48  ;;  %v6666_v56 = vpack.c.bf16 %v2039_v15, %v2038_v14  ;;  %v2043_v14 = vld [vmem:[%s7444_s3 + $0x68] sm:$0xff]  ;;  %v2061_v62 = vld [vmem:[%s7444_s3 + $0xf8] sm:$0xff] }
 0xc24   : > { %1848 = vrot.lane.b32.xlu0 %v4215_v19, %s5718_s5  ;;  %5232 = vmatpush1.bf16.msra.mxu1 %v6467_v38  ;;  %v2064_v19 = vld [vmem:[%s7444_s3 + $0x110] sm:$0xff]  ;;  %v6740_v12 = vpack.c.bf16 %v2061_v62, %v2060_v42 }
 0xc25   : > { %5266 = vmatprep.subr.bf16.mxu1 %v6486_v17 }
 0xc96   : > { %v1849_v57 = vpop.permute.xlu0 %1848 }
 0xc97   : > { %v1851_v54 = vmul.f32 %v5675_v52, %v1849_v57  ;;  %v2065_v57 = vld [vmem:[%s7444_s3 + $0x118] sm:$0xff] }
 0xc98   : > { %v6560_v49 = vpack.c.bf16 %v2065_v57, %v2064_v19  ;;  %v2070_v19 = vld [vmem:[%s7444_s3 + $0x140] sm:$0xff]  ;;  %v2071_v57 = vld [vmem:[%s7444_s3 + $0x148] sm:$0xff] }
 0xc99   : > { %1853 = vrot.lane.b32.xlu1 %v1851_v54, %s5719_s6  ;;  %v2050_v54 = vld [vmem:[%s7444_s3 + $0xa0] sm:$0xff]  ;;  %v6668_v3 = vpack.c.bf16 %v2071_v57, %v2070_v19  ;;  %v6720_v19 = vpack.c.bf16 %v2043_v14, %v2042_v47 }
 0xc9a   : > { %v2074_v57 = vld [vmem:[%s7444_s3 + $0x160] sm:$0xff] }
 0xd0b   : > { %v1854_v60 = vpop.permute.xlu1 %1853 }
 0xd0c   : > { %v6396_v5 = vadd.f32 %v1854_v60, %v1846_v2  ;;  %v2051_v60 = vld [vmem:[%s7444_s3 + $0xa8] sm:$0xff] }
 0xd0d   : > { %v6570_v6 = vpack.c.bf16 %v2051_v60, %v2050_v54  ;;  %v2056_v54 = vld [vmem:[%s7444_s3 + $0xd0] sm:$0xff]  ;;  %v2057_v60 = vld [vmem:[%s7444_s3 + $0xd8] sm:$0xff] }
 0xd0e   : > { %5676 = vtanh.f32 %v6396_v5  ;;  %v6678_v11 = vpack.c.bf16 %v2057_v60, %v2056_v54  ;;  %v2075_v54 = vld [vmem:[%s7444_s3 + $0x168] sm:$0xff] }
 0xd0f   : > { %v6731_v60 = vpack.c.bf16 %v2075_v54, %v2074_v57 }
 0xd18   : > { %v5677_v43 = vpop.eup %5676 }
 0xd19   : > { %1859 = vrot.lane.b32.xlu0 %v5677_v43, %s5718_s5  ;;  %v2036_v43 = vld [vmem:[%s7444_s3 + $0x30] sm:$0xff] }
 0xd8b   : > { %v1860_v18 = vpop.permute.xlu0 %1859 }
 0xd8c   : > { %v6490_v23 = vmul.f32 %v5675_v52, %v1860_v18  ;;  %v6528_v52 = vpack.c.bf16 %v2049_v13, %v2048_v50  ;;  %v2069_v18 = vld [vmem:[%s7444_s3 + $0x138] sm:$0xff]  ;;  %v6630_v50 = vpack.c.bf16 %v2037_v44, %v2036_v43  ;;  %v2058_v43 = vld [vmem:[%s7444_s3 + $0xe0] sm:$0xff]  ;;  %v2059_v44 = vld [vmem:[%s7444_s3 + $0xe8] sm:$0xff] }
 0xd8d   : > { %v6632_v13 = vpack.c.bf16 %v2069_v18, %v2068_v61  ;;  %v2090_v61 = vld [vmem:[%s7444_s3 + $0x1e0] sm:$0xff]  ;;  %v2091_v18 = vld [vmem:[%s7444_s3 + $0x1e8] sm:$0xff]  ;;  %v6708_v40 = vpack.c.bf16 %v2059_v44, %v2058_v43  ;;  %v6751_v43 = vpack.c.bf16 %v2045_v21, %v2044_v51  ;;  %v2093_v44 = vld [vmem:[%s7444_s3 + $0x1f8] sm:$0xff] }
 0xd8e   : > { %7473 = vst [vmem:[#allocation4_spill] sm:$0xff] %v6490_v23  ;;  %1880 = vrot.lane.b32.xlu1 %v6490_v23, %s5719_s6  ;;  %v6716_v15 = vpack.c.bf16 %v2091_v18, %v2090_v61  ;;  %v2076_v61 = vld [vmem:[%s7444_s3 + $0x170] sm:$0xff]  ;;  %v2077_v18 = vld [vmem:[%s7444_s3 + $0x178] sm:$0xff]  ;;  %v6763_v47 = vpack.c.bf16 %v2093_v44, %v2092_v22 }
 0xd8f   : > { %v6765_v14 = vpack.c.bf16 %v2077_v18, %v2076_v61 }
 0xe00   : > { %v6541_v2 = vpop.permute.xlu1 %1880 }
 0xe01   : > { %4216 = vmatmul.mubr.msk.f32.vlgmr.msra.gmra.mrb[22].mxu0 %vm346_vm2, %v6541_v2  ;;  %4217 = vmatmul.mubr.msk.f32.vlgmr.msra.gmra.mrb[18].mxu1 %vm346_vm2, %v6541_v2 }
 0xe02   : > { %5236 = vmatpush3.bf16.msra.mxu0 %v6518_v20  ;;  %5268 = vmatpush3.bf16.msra.mxu1 %v6520_v28 }
 0xe03   : > { %5238 = vmatprep.subr.bf16.mxu0 %v6528_v52  ;;  %5270 = vmatprep.subr.bf16.mxu1 %v6530_v16 }
 0xe06   : > { %5240 = vmatpush3.bf16.msra.mxu0 %v6558_v1  ;;  %5272 = vmatpush3.bf16.msra.mxu1 %v6560_v49 }
 0xe07   : > { %5242 = vmatprep.subr.bf16.mxu0 %v6570_v6  ;;  %5274 = vmatprep.subr.bf16.mxu1 %v6572_v10 }
 0xe0a   : > { %5244 = vmatpush3.bf16.msra.mxu0 %v6594_v25  ;;  %5276 = vmatpush3.bf16.msra.mxu1 %v6596_v36 }
 0xe0b   : > { %5246 = vmatprep.subr.bf16.mxu0 %v6606_v53  ;;  %5278 = vmatprep.subr.bf16.mxu1 %v6608_v59 }
 0xe0e   : > { %5248 = vmatpush3.bf16.msra.mxu0 %v6630_v50  ;;  %5280 = vmatpush3.bf16.msra.mxu1 %v6632_v13 }
 0xe0f   : > { %5250 = vmatprep.subr.bf16.mxu0 %v6642_v32  ;;  %5282 = vmatprep.subr.bf16.mxu1 %v6644_v45 }
 0xe12   : > { %5252 = vmatpush3.bf16.msra.mxu0 %v6666_v56  ;;  %5284 = vmatpush3.bf16.msra.mxu1 %v6668_v3 }
 0xe13   : > { %5254 = vmatprep.subr.bf16.mxu0 %v6678_v11  ;;  %5286 = vmatprep.subr.bf16.mxu1 %v6680_v33 }
 0xe16   : > { %5256 = vmatpush3.bf16.msra.mxu0 %v6702_v24  ;;  %5288 = vmatpush3.bf16.msra.mxu1 %v6704_v39 }
 0xe17   : > { %5258 = vmatprep.subr.bf16.mxu0 %v6708_v40  ;;  %5290 = vmatprep.subr.bf16.mxu1 %v6716_v15 }
 0xe1a   : > { %5260 = vmatpush3.bf16.msra.mxu0 %v6720_v19  ;;  %5292 = vmatpush3.bf16.msra.mxu1 %v6731_v60 }
 0xe1b   : > { %5262 = vmatprep.subr.bf16.mxu0 %v6740_v12  ;;  %5294 = vmatprep.subr.bf16.mxu1 %v6763_v47 }
 0xe1e   : > { %5264 = vmatpush3.bf16.msra.mxu0 %v6751_v43  ;;  %5296 = vmatpush3.bf16.msra.mxu1 %v6765_v14 }
 0xe1f   : > { %5297 = vmatprep.subr.bf16.mxu0 %v7466_v46  ;;  %5304 = vmatprep.subr.bf16.mxu1 %v6408_v0 }
 0xed4   : > { %v1950_v57 = vpop.f32.mrb[22].mxu0  ;;  %v2021_v54 = vpop.f32.mrb[18].mxu1 }
 0xed5   : > { %v1951_v42 = vadd.f32 %v1950_v57, %v6208_v29  ;;  %v2022_v62 = vadd.f32 %v2021_v54, %v6213_v30  ;;  %v1952_v51 = vpop.f32.mrb[23].mxu0  ;;  %v2023_v21 = vpop.f32.mrb[19].mxu1 }
 0xed6   : > { %v1953_v22 = vadd.f32 %v1952_v51, %v6218_v34  ;;  %v2024_v44 = vadd.f32 %v2023_v21, %v6223_v35 }
 0xed7   : > { %v2026_v23 = vmax.f32 %v1951_v42, 0.0  ;;  %v2028_v58 = vmax.f32 %v2022_v62, 0.0  ;;  %v7474_v42 = vld [vmem:[#allocation6_spill] sm:$0xff] }
 0xed8   : > { %v2027_v61 = vmax.f32 %v1953_v22, 0.0  ;;  %v2029_v18 = vmax.f32 %v2024_v44, 0.0 }
 0xeda   : > { %2158 = vmatprep.mubr.f32.mxu0 %v2027_v61  ;;  %2228 = vmatprep.mubr.f32.mxu1 %v2029_v18 }
 0xedb   : > { %2159 = vmatmul.mubr.f32.vlgmr.msra.gmra.mrb[24].mxu0 %v2026_v23  ;;  %2229 = vmatmul.mubr.f32.vlgmr.msra.gmra.mrb[20].mxu1 %v2028_v58 }
 0xedc   : > { %5299 = vmatpush3.bf16.msra.mxu0 %v5763_v4  ;;  %4917 = vmatprep.mubr.msk.f32.mxu0 %vm5716_vm0, %v7465_v9 }
 0xedd   : > { %5300 = vmatprep.subr.bf16.mxu0 %v7466_v46  ;;  %5306 = vmatpush1.bf16.msra.mxu1 %v6421_v7 }
 0xede   : > { %5308 = vmatprep.subr.bf16.mxu1 %v6446_v41  ;;  %2420 = vmatprep.mubr.f32.mxu1 %v7465_v9 }
 0xee0   : > { %5302 = vmatpush3.bf16.msra.mxu0 %v5776_v8 }
 0xee1   : > { %5312 = vmatprep.subr.bf16.mxu0 %v6419_v63  ;;  %5310 = vmatpush1.bf16.msra.mxu1 %v6460_v27 }
 0xee2   : > { %5320 = vmatprep.subr.bf16.mxu1 %v6478_v55 }
 0xee3   : > { %4918 = vmatmul.mubr.msk.f32.vlgmr.msra.gmra.mrb[26].mxu0 %vm346_vm2, %v6541_v2 }
 0xee4   : > { %5314 = vmatpush1.bf16.msra.mxu0 %v6433_v31  ;;  %2491 = vmatprep.mubr.f32.mxu0 %v7465_v9 }
 0xee5   : > { %5316 = vmatprep.subr.bf16.mxu0 %v6448_v48 }
 0xee8   : > { %5318 = vmatpush1.bf16.msra.mxu0 %v6467_v38 }
 0xee9   : > { %5352 = vmatprep.subr.bf16.mxu0 %v6486_v17 }
 0xfae   : > { %v4513_v29 = vpop.f32.mrb[24].mxu0  ;;  %v4548_v30 = vpop.f32.mrb[20].mxu1 }
 0xfaf   : > { %v4514_v34 = vpop.f32.mrb[25].mxu0  ;;  %v4549_v35 = vpop.f32.mrb[21].mxu1 }
 0xfb0   : > { %v4515_v58 = vadd.f32 %v4514_v34, %v4513_v29  ;;  %v4550_v23 = vadd.f32 %v4549_v35, %v4548_v30 }
 0xfb2   : > { %v2161_v57 = vadd.f32 %v4515_v58, %v7469_v26 }
 0xfb4   : > { %v2231_v54 = vadd.f32 %v4550_v23, %v2161_v57 }
 0xfb6   : > { %2234 = vst.msk [vmem:[%s6258_s12 + $0x18] sm:$0xff] %vm346_vm2, %v2231_v54  ;;  %v2305_v2 = vpop.f32.mrb[26].mxu0 }
 0xfb7   : > { %v2309_v62 = vadd.f32 %v2305_v2, %v7474_v42  ;;  %v4919_v51 = vpop.f32.mrb[27].mxu0  ;;  %v6850_v2 = vld [vmem:[%s7443_s2 + $0x80] sm:$0xff] }
 0xfb9   : > { %v4219_v21 = vmul.f32 -1.442695, %v2309_v62  ;;  %v6856_v62 = vld [vmem:[%s7443_s2 + $0x90] sm:$0xff] }
 0xfbb   : > { %5678 = vpow2.f32 %v4219_v21 }
 0xfc5   : > { %v5679_v22 = vpop.eup %5678 }
 0xfc6   : > { %v2313_v44 = vadd.f32 1.0, %v5679_v22 }
 0xfc8   : > { %5680 = vrcp.f32 %v2313_v44 }
 0xfd2   : > { %v5681_v61 = vpop.eup %5680 }
 0xfd3   : > { %v2316_v18 = vmul.f32 2.0, %v5681_v61  ;;  %v2318_v26 = vmul.f32 %v5681_v61, %v6396_v5 }
 0xfd5   : > { %v4220_v37 = vadd.f32 -1.0, %v2316_v18 }
 0xfd7   : > { %2320 = vrot.lane.b32.xlu0 %v4220_v37, %s5718_s5 }
0x1049   : > { %v2321_v29 = vpop.permute.xlu0 %2320 }
0x104a   : > { %v2323_v30 = vmul.f32 %v5681_v61, %v2321_v29 }
0x104c   : > { %2325 = vrot.lane.b32.xlu1 %v2323_v30, %s5719_s6 }
0x10be   : > { %v2326_v34 = vpop.permute.xlu1 %2325 }
0x10bf   : > { %v6801_v35 = vadd.f32 %v2326_v34, %v2318_v26 }
0x10c1   : > { %5682 = vtanh.f32 %v6801_v35 }
0x10cb   : > { %v5683_v58 = vpop.eup %5682 }
0x10cc   : > { %2331 = vrot.lane.b32.xlu0 %v5683_v58, %s5718_s5 }
0x113e   : > { %v2332_v23 = vpop.permute.xlu0 %2331 }
0x113f   : > { %v6805_v57 = vmul.f32 %v5681_v61, %v2332_v23  ;;  %v6868_v61 = vld [vmem:[%s7443_s2 + $0x98] sm:$0xff]  ;;  %v6892_v23 = vld [vmem:[%s7444_s3 + $0x200] sm:$0xff] }
0x1141   : > { %2352 = vrot.lane.b32.xlu1 %v6805_v57, %s5719_s6 }
0x11b3   : > { %v6809_v37 = vpop.permute.xlu1 %2352 }
0x11b4   : > { %4221 = vmatmul.mubr.msk.f32.vlgmr.msra.gmra.mrb[22].mxu1 %vm346_vm2, %v6809_v37  ;;  %4222 = vmatmul.mubr.msk.f32.vlgmr.msra.gmra.mrb[28].mxu0 %vm346_vm2, %v6809_v37 }
0x11b5   : > { %5322 = vmatpush3.bf16.msra.mxu1 %v6518_v20  ;;  %5354 = vmatpush3.bf16.msra.mxu0 %v6520_v28 }
0x11b6   : > { %5324 = vmatprep.subr.bf16.mxu1 %v6528_v52  ;;  %5356 = vmatprep.subr.bf16.mxu0 %v6530_v16 }
0x11b9   : > { %5326 = vmatpush3.bf16.msra.mxu1 %v6558_v1  ;;  %5358 = vmatpush3.bf16.msra.mxu0 %v6560_v49 }
0x11ba   : > { %5328 = vmatprep.subr.bf16.mxu1 %v6570_v6  ;;  %5360 = vmatprep.subr.bf16.mxu0 %v6572_v10 }
0x11bd   : > { %5330 = vmatpush3.bf16.msra.mxu1 %v6594_v25  ;;  %5362 = vmatpush3.bf16.msra.mxu0 %v6596_v36 }
0x11be   : > { %5332 = vmatprep.subr.bf16.mxu1 %v6606_v53  ;;  %5364 = vmatprep.subr.bf16.mxu0 %v6608_v59 }
0x11c1   : > { %5334 = vmatpush3.bf16.msra.mxu1 %v6630_v50  ;;  %5366 = vmatpush3.bf16.msra.mxu0 %v6632_v13 }
0x11c2   : > { %5336 = vmatprep.subr.bf16.mxu1 %v6642_v32  ;;  %5368 = vmatprep.subr.bf16.mxu0 %v6644_v45 }
0x11c5   : > { %5338 = vmatpush3.bf16.msra.mxu1 %v6666_v56  ;;  %5370 = vmatpush3.bf16.msra.mxu0 %v6668_v3 }
0x11c6   : > { %5340 = vmatprep.subr.bf16.mxu1 %v6678_v11  ;;  %5372 = vmatprep.subr.bf16.mxu0 %v6680_v33 }
0x11c9   : > { %5342 = vmatpush3.bf16.msra.mxu1 %v6702_v24  ;;  %5374 = vmatpush3.bf16.msra.mxu0 %v6704_v39 }
0x11ca   : > { %5344 = vmatprep.subr.bf16.mxu1 %v6708_v40  ;;  %5376 = vmatprep.subr.bf16.mxu0 %v6716_v15 }
0x11cd   : > { %5346 = vmatpush3.bf16.msra.mxu1 %v6720_v19  ;;  %5378 = vmatpush3.bf16.msra.mxu0 %v6731_v60 }
0x11ce   : > { %5348 = vmatprep.subr.bf16.mxu1 %v6740_v12  ;;  %5380 = vmatprep.subr.bf16.mxu0 %v6763_v47 }
0x11d1   : > { %5350 = vmatpush3.bf16.msra.mxu1 %v6751_v43  ;;  %5382 = vmatpush3.bf16.msra.mxu0 %v6765_v14 }
0x11d2   : > { %5383 = vmatprep.subr.bf16.mxu1 %v7466_v46  ;;  %5390 = vmatprep.subr.bf16.mxu0 %v6408_v0  ;;  %v6862_v0 = vld [vmem:[%s7443_s2 + $0x88] sm:$0xff] }
0x1287   : > { %v2422_v5 = vpop.f32.mrb[22].mxu1  ;;  %v2493_v54 = vpop.f32.mrb[28].mxu0 }
0x1288   : > { %v2423_v42 = vadd.f32 %v6850_v2, %v2422_v5  ;;  %v2494_v51 = vadd.f32 %v6856_v62, %v2493_v54  ;;  %v2424_v21 = vpop.f32.mrb[23].mxu1  ;;  %v2495_v22 = vpop.f32.mrb[29].mxu0 }
0x1289   : > { %v2425_v44 = vadd.f32 %v6862_v0, %v2424_v21  ;;  %v2496_v18 = vadd.f32 %v6868_v61, %v2495_v22 }
0x128a   : > { %v2498_v26 = vmax.f32 %v2423_v42, 0.0  ;;  %v2500_v34 = vmax.f32 %v2494_v51, 0.0 }
0x128b   : > { %v2499_v29 = vmax.f32 %v2425_v44, 0.0  ;;  %v2501_v30 = vmax.f32 %v2496_v18, 0.0 }
0x128d   : > { %2630 = vmatprep.mubr.f32.mxu1 %v2499_v29  ;;  %2700 = vmatprep.mubr.f32.mxu0 %v2501_v30 }
0x128e   : > { %2631 = vmatmul.mubr.f32.vlgmr.msra.gmra.mrb[24].mxu1 %v2498_v26  ;;  %2701 = vmatmul.mubr.f32.vlgmr.msra.gmra.mrb[30].mxu0 %v2500_v34 }
0x128f   : > { %5385 = vmatpush3.bf16.msra.mxu1 %v5763_v4  ;;  %4928 = vmatprep.mubr.msk.f32.mxu1 %vm5716_vm0, %v7465_v9 }
0x1290   : > { %5386 = vmatprep.subr.bf16.mxu1 %v7466_v46  ;;  %5392 = vmatpush1.bf16.msra.mxu0 %v6421_v7 }
0x1291   : > { %5394 = vmatprep.subr.bf16.mxu0 %v6446_v41  ;;  %2892 = vmatprep.mubr.f32.mxu0 %v7465_v9 }
0x1293   : > { %5388 = vmatpush3.bf16.msra.mxu1 %v5776_v8 }
0x1294   : > { %5398 = vmatprep.subr.bf16.mxu1 %v6419_v63  ;;  %5396 = vmatpush1.bf16.msra.mxu0 %v6460_v27 }
0x1295   : > { %5406 = vmatprep.subr.bf16.mxu0 %v6478_v55 }
0x1296   : > { %4929 = vmatmul.mubr.msk.f32.vlgmr.msra.gmra.mrb[26].mxu1 %vm346_vm2, %v6809_v37 }
0x1297   : > { %5400 = vmatpush1.bf16.msra.mxu1 %v6433_v31  ;;  %2963 = vmatprep.mubr.f32.mxu1 %v7465_v9 }
0x1298   : > { %5402 = vmatprep.subr.bf16.mxu1 %v6448_v48 }
0x129b   : > { %5404 = vmatpush1.bf16.msra.mxu1 %v6467_v38  ;;  %v7475_v38 = vld [vmem:[#allocation5_spill] sm:$0xff] }
0x129c   : > { %5438 = vmatprep.subr.bf16.mxu1 %v6486_v17 }
0x1361   : > { %v4588_v7 = vpop.f32.mrb[24].mxu1  ;;  %v4623_v63 = vpop.f32.mrb[30].mxu0 }
0x1362   : > { %v4589_v41 = vpop.f32.mrb[25].mxu1  ;;  %v4624_v27 = vpop.f32.mrb[31].mxu0 }
0x1363   : > { %v4590_v58 = vadd.f32 %v4589_v41, %v4588_v7  ;;  %v4625_v55 = vadd.f32 %v4624_v27, %v4623_v63 }
0x1365   : > { %v2633_v31 = vadd.f32 %v6892_v23, %v4590_v58 }
0x1367   : > { %v2703_v37 = vadd.f32 %v4625_v55, %v2633_v31 }
0x1369   : > { %2706 = vst.msk [vmem:[%s6258_s12 + $0x20] sm:$0xff] %vm346_vm2, %v2703_v37  ;;  %v2777_v48 = vpop.f32.mrb[26].mxu1 }
0x136a   : > { %v2781_v5 = vadd.f32 %v7475_v38, %v2777_v48  ;;  %v4930_v17 = vpop.f32.mrb[27].mxu1  ;;  %v3280_v48 = vld [vmem:[%s7443_s2 + $0x8] sm:$0xff] }
0x136b   : > { %v3284_v38 = vld [vmem:[%s7443_s2 + $0x28] sm:$0xff] }
0x136c   : > { %v4224_v54 = vmul.f32 -1.442695, %v2781_v5  ;;  %v3282_v5 = vld [vmem:[%s7443_s2 + $0x18] sm:$0xff]  ;;  %v6973_v17 = vpack.c.bf16 %v3284_v38, %v3280_v48  ;;  %v3498_v48 = vld [vmem:[%s7444_s3 + $0x1a0] sm:$0xff]  ;;  %v3499_v38 = vld [vmem:[%s7444_s3 + $0x1a8] sm:$0xff] }
0x136e   : > { %5684 = vpow2.f32 %v4224_v54  ;;  %v3286_v54 = vld [vmem:[%s7443_s2 + $0x38] sm:$0xff] }
0x1378   : > { %v5685_v42 = vpop.eup %5684 }
0x1379   : > { %v2785_v51 = vadd.f32 1.0, %v5685_v42  ;;  %v3279_v42 = vld [vmem:[%s7443_s2] sm:$0xff] }
0x137b   : > { %5686 = vrcp.f32 %v2785_v51  ;;  %v3283_v51 = vld [vmem:[%s7443_s2 + $0x20] sm:$0xff] }
0x1385   : > { %v5687_v21 = vpop.eup %5686 }
0x1386   : > { %v2788_v22 = vmul.f32 2.0, %v5687_v21  ;;  %v2790_v30 = vmul.f32 %v5687_v21, %v6801_v35 }
0x1388   : > { %v4225_v44 = vadd.f32 -1.0, %v2788_v22  ;;  %v6986_v22 = vpack.c.bf16 %v3283_v51, %v3279_v42  ;;  %v3450_v42 = vld [vmem:[%s7444_s3 + $0x20] sm:$0xff]  ;;  %v3451_v51 = vld [vmem:[%s7444_s3 + $0x28] sm:$0xff] }
0x138a   : > { %2792 = vrot.lane.b32.xlu0 %v4225_v44, %s5718_s5  ;;  %v3281_v44 = vld [vmem:[%s7443_s2 + $0x10] sm:$0xff] }
0x13fc   : > { %v2793_v18 = vpop.permute.xlu0 %2792 }
0x13fd   : > { %v2795_v29 = vmul.f32 %v5687_v21, %v2793_v18  ;;  %v3285_v18 = vld [vmem:[%s7443_s2 + $0x30] sm:$0xff] }
0x13ff   : > { %2797 = vrot.lane.b32.xlu1 %v2795_v29, %s5719_s6  ;;  %v3288_v29 = vld [vmem:[%s7443_s2 + $0x48] sm:$0xff] }
0x1471   : > { %v2798_v26 = vpop.permute.xlu1 %2797 }
0x1472   : > { %v6901_v34 = vadd.f32 %v2798_v26, %v2790_v30  ;;  %v6998_v30 = vpack.c.bf16 %v3285_v18, %v3281_v44  ;;  %v3292_v26 = vld [vmem:[%s7443_s2 + $0x68] sm:$0xff]  ;;  %v7137_v18 = vpack.c.bf16 %v3499_v38, %v3498_v48  ;;  %v3504_v48 = vld [vmem:[%s7444_s3 + $0x1d0] sm:$0xff]  ;;  %v3505_v38 = vld [vmem:[%s7444_s3 + $0x1d8] sm:$0xff] }
0x1474   : > { %5688 = vtanh.f32 %v6901_v34 }
0x147e   : > { %v5689_v7 = vpop.eup %5688 }
0x147f   : > { %2803 = vrot.lane.b32.xlu0 %v5689_v7, %s5718_s5  ;;  %v3294_v7 = vld [vmem:[%s7443_s2 + $0x78] sm:$0xff] }
0x14f1   : > { %v2804_v63 = vpop.permute.xlu0 %2803 }
0x14f2   : > { %v6905_v41 = vmul.f32 %v5687_v21, %v2804_v63  ;;  %v6984_v21 = vpack.c.bf16 %v3286_v54, %v3282_v5  ;;  %v7011_v63 = vpack.c.bf16 %v3292_v26, %v3288_v29  ;;  %v3482_v29 = vld [vmem:[%s7444_s3 + $0x120] sm:$0xff]  ;;  %v3483_v26 = vld [vmem:[%s7444_s3 + $0x128] sm:$0xff] }
0x14f4   : > { %2824 = vrot.lane.b32.xlu1 %v6905_v41, %s5719_s6 }
0x1566   : > { %v2825_v27 = vpop.permute.xlu1 %2824 }
0x1567   : > { %4226 = vmatmul.mubr.msk.f32.vlgmr.msra.gmra.mrb[32].mxu0 %vm346_vm2, %v2825_v27  ;;  %4227 = vmatmul.mubr.msk.f32.vlgmr.msra.gmra.mrb[28].mxu1 %vm346_vm2, %v2825_v27 }
0x1568   : > { %5408 = vmatpush3.bf16.msra.mxu0 %v6518_v20  ;;  %5440 = vmatpush3.bf16.msra.mxu1 %v6520_v28 }
0x1569   : > { %5410 = vmatprep.subr.bf16.mxu0 %v6528_v52  ;;  %5442 = vmatprep.subr.bf16.mxu1 %v6530_v16 }
0x156c   : > { %5412 = vmatpush3.bf16.msra.mxu0 %v6558_v1  ;;  %5444 = vmatpush3.bf16.msra.mxu1 %v6560_v49 }
0x156d   : > { %5414 = vmatprep.subr.bf16.mxu0 %v6570_v6  ;;  %5446 = vmatprep.subr.bf16.mxu1 %v6572_v10 }
0x1570   : > { %5416 = vmatpush3.bf16.msra.mxu0 %v6594_v25  ;;  %5448 = vmatpush3.bf16.msra.mxu1 %v6596_v36 }
0x1571   : > { %5418 = vmatprep.subr.bf16.mxu0 %v6606_v53  ;;  %5450 = vmatprep.subr.bf16.mxu1 %v6608_v59 }
0x1574   : > { %5420 = vmatpush3.bf16.msra.mxu0 %v6630_v50  ;;  %5452 = vmatpush3.bf16.msra.mxu1 %v6632_v13 }
0x1575   : > { %5422 = vmatprep.subr.bf16.mxu0 %v6642_v32  ;;  %5454 = vmatprep.subr.bf16.mxu1 %v6644_v45 }
0x1578   : > { %5424 = vmatpush3.bf16.msra.mxu0 %v6666_v56  ;;  %5456 = vmatpush3.bf16.msra.mxu1 %v6668_v3 }
0x1579   : > { %5426 = vmatprep.subr.bf16.mxu0 %v6678_v11  ;;  %5458 = vmatprep.subr.bf16.mxu1 %v6680_v33 }
0x157c   : > { %5428 = vmatpush3.bf16.msra.mxu0 %v6702_v24  ;;  %5460 = vmatpush3.bf16.msra.mxu1 %v6704_v39  ;;  %v7476_v39 = vld [vmem:[#allocation8_spill] sm:$0xff] }
0x157d   : > { %5430 = vmatprep.subr.bf16.mxu0 %v6708_v40  ;;  %5462 = vmatprep.subr.bf16.mxu1 %v6716_v15 }
0x1580   : > { %5432 = vmatpush3.bf16.msra.mxu0 %v6720_v19  ;;  %5464 = vmatpush3.bf16.msra.mxu1 %v6731_v60 }
0x1581   : > { %5434 = vmatprep.subr.bf16.mxu0 %v6740_v12  ;;  %5466 = vmatprep.subr.bf16.mxu1 %v6763_v47 }
0x1584   : > { %5436 = vmatpush3.bf16.msra.mxu0 %v6751_v43  ;;  %5468 = vmatpush3.bf16.msra.mxu1 %v6765_v14 }
0x1585   : > { %5469 = vmatprep.subr.bf16.mxu0 %v7466_v46  ;;  %5476 = vmatprep.subr.bf16.mxu1 %v6973_v17 }
0x163a   : > { %v2894_v20 = vpop.f32.mrb[32].mxu0  ;;  %v2965_v28 = vpop.f32.mrb[28].mxu1 }
0x163b   : > { %v2895_v52 = vadd.f32 %v6850_v2, %v2894_v20  ;;  %v2966_v16 = vadd.f32 %v6856_v62, %v2965_v28  ;;  %v2896_v1 = vpop.f32.mrb[33].mxu0  ;;  %v2967_v49 = vpop.f32.mrb[29].mxu1  ;;  %v3287_v20 = vld [vmem:[%s7443_s2 + $0x40] sm:$0xff] }
0x163c   : > { %v2897_v6 = vadd.f32 %v6862_v0, %v2896_v1  ;;  %v2968_v10 = vadd.f32 %v6868_v61, %v2967_v49  ;;  %v3291_v28 = vld [vmem:[%s7443_s2 + $0x60] sm:$0xff]  ;;  %v3293_v1 = vld [vmem:[%s7443_s2 + $0x70] sm:$0xff] }
0x163d   : > { %v2970_v53 = vmax.f32 %v2895_v52, 0.0  ;;  %v2972_v59 = vmax.f32 %v2966_v16, 0.0  ;;  %v3289_v52 = vld [vmem:[%s7443_s2 + $0x50] sm:$0xff]  ;;  %v7025_v16 = vpack.c.bf16 %v3291_v28, %v3287_v20  ;;  %v3501_v28 = vld [vmem:[%s7444_s3 + $0x1b8] sm:$0xff] }
0x163e   : > { %v2971_v25 = vmax.f32 %v2897_v6, 0.0  ;;  %v2973_v36 = vmax.f32 %v2968_v10, 0.0  ;;  %v7032_v49 = vpack.c.bf16 %v3293_v1, %v3289_v52  ;;  %v3462_v10 = vld [vmem:[%s7444_s3 + $0x80] sm:$0xff]  ;;  %v3500_v20 = vld [vmem:[%s7444_s3 + $0x1b0] sm:$0xff]  ;;  %v7159_v52 = vpack.c.bf16 %v3451_v51, %v3450_v42 }
0x163f   : > { %v7161_v1 = vpack.c.bf16 %v3483_v26, %v3482_v29  ;;  %v3456_v29 = vld [vmem:[%s7444_s3 + $0x50] sm:$0xff]  ;;  %v3457_v26 = vld [vmem:[%s7444_s3 + $0x58] sm:$0xff] }
0x1640   : > { %3102 = vmatprep.mubr.f32.mxu0 %v2971_v25  ;;  %3172 = vmatprep.mubr.f32.mxu1 %v2973_v36  ;;  %v3463_v25 = vld [vmem:[%s7444_s3 + $0x88] sm:$0xff] }
0x1641   : > { %3103 = vmatmul.mubr.f32.vlgmr.msra.gmra.mrb[34].mxu0 %v2970_v53  ;;  %3173 = vmatmul.mubr.f32.vlgmr.msra.gmra.mrb[30].mxu1 %v2972_v59  ;;  %v7043_v36 = vpack.c.bf16 %v3463_v25, %v3462_v10  ;;  %v3494_v53 = vld [vmem:[%s7444_s3 + $0x180] sm:$0xff]  ;;  %v3495_v59 = vld [vmem:[%s7444_s3 + $0x188] sm:$0xff]  ;;  %v3453_v10 = vld [vmem:[%s7444_s3 + $0x38] sm:$0xff] }
0x1642   : > { %5471 = vmatpush3.bf16.msra.mxu0 %v5763_v4  ;;  %4939 = vmatprep.mubr.msk.f32.mxu0 %vm5716_vm0, %v7465_v9 }
0x1643   : > { %5472 = vmatprep.subr.bf16.mxu0 %v7466_v46  ;;  %3364 = vmatprep.mubr.f32.mxu1 %v7465_v9 }
0x1644   : > { %5478 = vmatpush1.bf16.msra.mxu1 %v6986_v22 }
0x1645   : > { %5480 = vmatprep.subr.bf16.mxu1 %v7011_v63 }
0x1646   : > { %5474 = vmatpush3.bf16.msra.mxu0 %v5776_v8 }
0x1647   : > { %5484 = vmatprep.subr.bf16.mxu0 %v6984_v21 }
0x1648   : > { %5482 = vmatpush1.bf16.msra.mxu1 %v7025_v16 }
0x1649   : > { %4940 = vmatmul.mubr.msk.f32.vlgmr.msra.gmra.mrb[36].mxu0 %vm346_vm2, %v2825_v27  ;;  %5492 = vmatprep.subr.bf16.mxu1 %v7043_v36 }
0x164a   : > { %3435 = vmatprep.mubr.f32.mxu0 %v7465_v9  ;;  %5486 = vmatpush1.bf16.msra.mxu0 %v6998_v30 }
0x1714   : > { %v4663_v50 = vpop.f32.mrb[34].mxu0  ;;  %v4698_v13 = vpop.f32.mrb[30].mxu1 }
0x1715   : > { %v4664_v32 = vpop.f32.mrb[35].mxu0  ;;  %v4699_v45 = vpop.f32.mrb[31].mxu1 }
0x1716   : > { %v4665_v56 = vadd.f32 %v4664_v32, %v4663_v50  ;;  %v4700_v3 = vadd.f32 %v4699_v45, %v4698_v13  ;;  %v7051_v50 = vpack.c.bf16 %v3495_v59, %v3494_v53  ;;  %v3446_v45 = vld [vmem:[%s7444_s3] sm:$0xff]  ;;  %v7173_v53 = vpack.c.bf16 %v3501_v28, %v3500_v20  ;;  %v3484_v59 = vld [vmem:[%s7444_s3 + $0x130] sm:$0xff]  ;;  %v3489_v28 = vld [vmem:[%s7444_s3 + $0x158] sm:$0xff] }
0x1717   : > { %v3488_v20 = vld [vmem:[%s7444_s3 + $0x150] sm:$0xff] }
0x1718   : > { %v3105_v11 = vadd.f32 %v6892_v23, %v4665_v56  ;;  %v3447_v56 = vld [vmem:[%s7444_s3 + $0x8] sm:$0xff] }
0x171a   : > { %v3175_v33 = vadd.f32 %v4700_v3, %v3105_v11  ;;  %v3478_v3 = vld [vmem:[%s7444_s3 + $0x100] sm:$0xff]  ;;  %v3479_v11 = vld [vmem:[%s7444_s3 + $0x108] sm:$0xff] }
0x171c   : > { %3178 = vst.msk [vmem:[%s6258_s12 + $0x28] sm:$0xff] %vm346_vm2, %v3175_v33  ;;  %v3249_v24 = vpop.f32.mrb[36].mxu0  ;;  %v3464_v33 = vld [vmem:[%s7444_s3 + $0x90] sm:$0xff] }
0x171d   : > { %v3253_v40 = vadd.f32 %v3249_v24, %v7476_v39  ;;  %v4941_v15 = vpop.f32.mrb[37].mxu0  ;;  %v3465_v24 = vld [vmem:[%s7444_s3 + $0x98] sm:$0xff]  ;;  %v3496_v39 = vld [vmem:[%s7444_s3 + $0x190] sm:$0xff] }
0x171e   : > { %v7083_v15 = vpack.c.bf16 %v3447_v56, %v3446_v45  ;;  %v3470_v45 = vld [vmem:[%s7444_s3 + $0xc0] sm:$0xff]  ;;  %v3471_v56 = vld [vmem:[%s7444_s3 + $0xc8] sm:$0xff] }
0x171f   : > { %v4229_v19 = vmul.f32 -1.442695, %v3253_v40  ;;  %v3497_v40 = vld [vmem:[%s7444_s3 + $0x198] sm:$0xff] }
0x1721   : > { %5690 = vpow2.f32 %v4229_v19  ;;  %v7085_v19 = vpack.c.bf16 %v3479_v11, %v3478_v3  ;;  %v3502_v3 = vld [vmem:[%s7444_s3 + $0x1c0] sm:$0xff]  ;;  %v3503_v11 = vld [vmem:[%s7444_s3 + $0x1c8] sm:$0xff] }
0x172b   : > { %v5691_v60 = vpop.eup %5690 }
0x172c   : > { %v3257_v12 = vadd.f32 1.0, %v5691_v60  ;;  %v3448_v60 = vld [vmem:[%s7444_s3 + $0x10] sm:$0xff] }
0x172e   : > { %5692 = vrcp.f32 %v3257_v12  ;;  %v3449_v12 = vld [vmem:[%s7444_s3 + $0x18] sm:$0xff] }
0x172f   : > { %v7123_v5 = vpack.c.bf16 %v3449_v12, %v3448_v60  ;;  %v7207_v60 = vpack.c.bf16 %v3471_v56, %v3470_v45  ;;  %v7209_v12 = vpack.c.bf16 %v3503_v11, %v3502_v3  ;;  %v7267_v45 = vpack.c.bf16 %v3457_v26, %v3456_v29  ;;  %v3458_v11 = vld [vmem:[%s7444_s3 + $0x60] sm:$0xff]  ;;  %v3460_v26 = vld [vmem:[%s7444_s3 + $0x70] sm:$0xff] }
0x1730   : > { %v7269_v56 = vpack.c.bf16 %v3489_v28, %v3488_v20  ;;  %v3461_v20 = vld [vmem:[%s7444_s3 + $0x78] sm:$0xff]  ;;  %v3508_v28 = vld [vmem:[%s7444_s3 + $0x1f0] sm:$0xff] }
0x1738   : > { %v5693_v43 = vpop.eup %5692 }
0x1739   : > { %v3260_v47 = vmul.f32 2.0, %v5693_v43  ;;  %v3262_v55 = vmul.f32 %v5693_v43, %v6901_v34  ;;  %v3290_v34 = vld [vmem:[%s7443_s2 + $0x58] sm:$0xff] }
0x173a   : > { %v7013_v27 = vpack.c.bf16 %v3294_v7, %v3290_v34  ;;  %v3468_v34 = vld [vmem:[%s7444_s3 + $0xb0] sm:$0xff]  ;;  %v3469_v7 = vld [vmem:[%s7444_s3 + $0xb8] sm:$0xff] }
0x173b   : > { %v4230_v14 = vadd.f32 -1.0, %v3260_v47  ;;  %v7095_v47 = vpack.c.bf16 %v3497_v40, %v3496_v39  ;;  %v7171_v25 = vpack.c.bf16 %v3469_v7, %v3468_v34  ;;  %v3454_v39 = vld [vmem:[%s7444_s3 + $0x40] sm:$0xff]  ;;  %v3455_v40 = vld [vmem:[%s7444_s3 + $0x48] sm:$0xff]  ;;  %v7245_v7 = vpack.c.bf16 %v3505_v38, %v3504_v48  ;;  %v3476_v48 = vld [vmem:[%s7444_s3 + $0xf0] sm:$0xff] }
0x173c   : > { %5488 = vmatprep.subr.bf16.mxu0 %v7013_v27  ;;  %v7231_v42 = vpack.c.bf16 %v3455_v40, %v3454_v39  ;;  %v3459_v39 = vld [vmem:[%s7444_s3 + $0x68] sm:$0xff]  ;;  %v3477_v38 = vld [vmem:[%s7444_s3 + $0xf8] sm:$0xff] }
0x173d   : > { %3264 = vrot.lane.b32.xlu0 %v4230_v14, %s5718_s5  ;;  %5490 = vmatpush1.bf16.msra.mxu0 %v7032_v49  ;;  %v3480_v14 = vld [vmem:[%s7444_s3 + $0x110] sm:$0xff]  ;;  %v7305_v29 = vpack.c.bf16 %v3477_v38, %v3476_v48 }
0x173e   : > { %5524 = vmatprep.subr.bf16.mxu0 %v7051_v50 }
0x17af   : > { %v3265_v35 = vpop.permute.xlu0 %3264 }
0x17b0   : > { %v3267_v58 = vmul.f32 %v5693_v43, %v3265_v35  ;;  %v3481_v35 = vld [vmem:[%s7444_s3 + $0x118] sm:$0xff] }
0x17b1   : > { %v7125_v54 = vpack.c.bf16 %v3481_v35, %v3480_v14  ;;  %v3486_v14 = vld [vmem:[%s7444_s3 + $0x140] sm:$0xff]  ;;  %v3487_v35 = vld [vmem:[%s7444_s3 + $0x148] sm:$0xff] }
0x17b2   : > { %3269 = vrot.lane.b32.xlu1 %v3267_v58, %s5719_s6  ;;  %v3466_v58 = vld [vmem:[%s7444_s3 + $0xa0] sm:$0xff]  ;;  %v7233_v51 = vpack.c.bf16 %v3487_v35, %v3486_v14  ;;  %v7285_v14 = vpack.c.bf16 %v3459_v39, %v3458_v11 }
0x17b3   : > { %v3490_v35 = vld [vmem:[%s7444_s3 + $0x160] sm:$0xff] }
0x1824   : > { %v3270_v31 = vpop.permute.xlu1 %3269 }
0x1825   : > { %v6961_v37 = vadd.f32 %v3270_v31, %v3262_v55  ;;  %v3467_v31 = vld [vmem:[%s7444_s3 + $0xa8] sm:$0xff] }
0x1826   : > { %v7135_v44 = vpack.c.bf16 %v3467_v31, %v3466_v58  ;;  %v3472_v58 = vld [vmem:[%s7444_s3 + $0xd0] sm:$0xff]  ;;  %v3473_v31 = vld [vmem:[%s7444_s3 + $0xd8] sm:$0xff] }
0x1827   : > { %5694 = vtanh.f32 %v6961_v37  ;;  %v7243_v34 = vpack.c.bf16 %v3473_v31, %v3472_v58  ;;  %v3491_v58 = vld [vmem:[%s7444_s3 + $0x168] sm:$0xff] }
0x1828   : > { %v7296_v31 = vpack.c.bf16 %v3491_v58, %v3490_v35 }
0x1831   : > { %v5695_v6 = vpop.eup %5694 }
0x1832   : > { %3275 = vrot.lane.b32.xlu0 %v5695_v6, %s5718_s5  ;;  %v3452_v6 = vld [vmem:[%s7444_s3 + $0x30] sm:$0xff] }
0x18a4   : > { %v3276_v13 = vpop.permute.xlu0 %3275 }
0x18a5   : > { %v7055_v32 = vmul.f32 %v5693_v43, %v3276_v13  ;;  %v7093_v43 = vpack.c.bf16 %v3465_v24, %v3464_v33  ;;  %v3485_v13 = vld [vmem:[%s7444_s3 + $0x138] sm:$0xff]  ;;  %v7195_v33 = vpack.c.bf16 %v3453_v10, %v3452_v6  ;;  %v3474_v6 = vld [vmem:[%s7444_s3 + $0xe0] sm:$0xff]  ;;  %v3475_v10 = vld [vmem:[%s7444_s3 + $0xe8] sm:$0xff] }
0x18a6   : > { %v7197_v24 = vpack.c.bf16 %v3485_v13, %v3484_v59  ;;  %v3506_v59 = vld [vmem:[%s7444_s3 + $0x1e0] sm:$0xff]  ;;  %v3507_v13 = vld [vmem:[%s7444_s3 + $0x1e8] sm:$0xff]  ;;  %v7273_v3 = vpack.c.bf16 %v3475_v10, %v3474_v6  ;;  %v7316_v6 = vpack.c.bf16 %v3461_v20, %v3460_v26  ;;  %v3509_v10 = vld [vmem:[%s7444_s3 + $0x1f8] sm:$0xff] }
0x18a7   : > { %3296 = vrot.lane.b32.xlu1 %v7055_v32, %s5719_s6  ;;  %v7281_v40 = vpack.c.bf16 %v3507_v13, %v3506_v59  ;;  %v3492_v59 = vld [vmem:[%s7444_s3 + $0x170] sm:$0xff]  ;;  %v3493_v13 = vld [vmem:[%s7444_s3 + $0x178] sm:$0xff]  ;;  %v7328_v11 = vpack.c.bf16 %v3509_v10, %v3508_v28 }
0x18a8   : > { %7477 = vst [vmem:[#allocation3_spill] sm:$0xff] %v7316_v6  ;;  %v7330_v39 = vpack.c.bf16 %v3493_v13, %v3492_v59 }
0x18a9   : > { %7478 = vst [vmem:[#allocation6_spill] sm:$0xff] %v7328_v11 }
0x1919   : > { %v7106_v55 = vpop.permute.xlu1 %3296 }
0x191a   : > { %4231 = vmatmul.mubr.msk.f32.vlgmr.msra.gmra.mrb[32].mxu1 %vm346_vm2, %v7106_v55  ;;  %4232 = vmatmul.mubr.msk.f32.vlgmr.msra.gmra.mrb[38].mxu0 %vm346_vm2, %v7106_v55 }
0x191b   : > { %5494 = vmatpush3.bf16.msra.mxu1 %v7083_v15  ;;  %5526 = vmatpush3.bf16.msra.mxu0 %v7085_v19 }
0x191c   : > { %5496 = vmatprep.subr.bf16.mxu1 %v7093_v43  ;;  %5528 = vmatprep.subr.bf16.mxu0 %v7095_v47 }
0x191f   : > { %5498 = vmatpush3.bf16.msra.mxu1 %v7123_v5  ;;  %5530 = vmatpush3.bf16.msra.mxu0 %v7125_v54 }
0x1920   : > { %5500 = vmatprep.subr.bf16.mxu1 %v7135_v44  ;;  %5532 = vmatprep.subr.bf16.mxu0 %v7137_v18 }
0x1923   : > { %5502 = vmatpush3.bf16.msra.mxu1 %v7159_v52  ;;  %5534 = vmatpush3.bf16.msra.mxu0 %v7161_v1 }
0x1924   : > { %5504 = vmatprep.subr.bf16.mxu1 %v7171_v25  ;;  %5536 = vmatprep.subr.bf16.mxu0 %v7173_v53 }
0x1927   : > { %5506 = vmatpush3.bf16.msra.mxu1 %v7195_v33  ;;  %5538 = vmatpush3.bf16.msra.mxu0 %v7197_v24 }
0x1928   : > { %5508 = vmatprep.subr.bf16.mxu1 %v7207_v60  ;;  %5540 = vmatprep.subr.bf16.mxu0 %v7209_v12 }
0x192b   : > { %5510 = vmatpush3.bf16.msra.mxu1 %v7231_v42  ;;  %5542 = vmatpush3.bf16.msra.mxu0 %v7233_v51 }
0x192c   : > { %5512 = vmatprep.subr.bf16.mxu1 %v7243_v34  ;;  %5544 = vmatprep.subr.bf16.mxu0 %v7245_v7 }
0x192f   : > { %5514 = vmatpush3.bf16.msra.mxu1 %v7267_v45  ;;  %5546 = vmatpush3.bf16.msra.mxu0 %v7269_v56 }
0x1930   : > { %5516 = vmatprep.subr.bf16.mxu1 %v7273_v3  ;;  %5548 = vmatprep.subr.bf16.mxu0 %v7281_v40 }
0x1933   : > { %5518 = vmatpush3.bf16.msra.mxu1 %v7285_v14  ;;  %5550 = vmatpush3.bf16.msra.mxu0 %v7296_v31 }
0x1934   : > { %5520 = vmatprep.subr.bf16.mxu1 %v7305_v29  ;;  %5552 = vmatprep.subr.bf16.mxu0 %v7328_v11 }
0x1937   : > { %5522 = vmatpush3.bf16.msra.mxu1 %v7316_v6  ;;  %5554 = vmatpush3.bf16.msra.mxu0 %v7330_v39 }
0x1938   : > { %5555 = vmatprep.subr.bf16.mxu1 %v7466_v46  ;;  %5562 = vmatprep.subr.bf16.mxu0 %v6973_v17 }
0x19ed   : > { %v3366_v35 = vpop.f32.mrb[32].mxu1  ;;  %v3437_v58 = vpop.f32.mrb[38].mxu0 }
0x19ee   : > { %v3367_v48 = vadd.f32 %v6850_v2, %v3366_v35  ;;  %v3438_v38 = vadd.f32 %v6856_v62, %v3437_v58  ;;  %v3368_v26 = vpop.f32.mrb[33].mxu1  ;;  %v3439_v20 = vpop.f32.mrb[39].mxu0 }
0x19ef   : > { %v3369_v28 = vadd.f32 %v6862_v0, %v3368_v26  ;;  %v3440_v10 = vadd.f32 %v6868_v61, %v3439_v20 }
0x19f0   : > { %v3442_v6 = vmax.f32 %v3367_v48, 0.0  ;;  %v3444_v11 = vmax.f32 %v3438_v38, 0.0 }
0x19f1   : > { %v3443_v59 = vmax.f32 %v3369_v28, 0.0  ;;  %v3445_v13 = vmax.f32 %v3440_v10, 0.0  ;;  %v7480_v10 = vld [vmem:[#allocation2_spill] sm:$0xff] }
0x19f3   : > { %3574 = vmatprep.mubr.f32.mxu1 %v3443_v59  ;;  %3644 = vmatprep.mubr.f32.mxu0 %v3445_v13  ;;  %v7481_v59 = vld [vmem:[#allocation9_spill] sm:$0xff] }
0x19f4   : > { %3575 = vmatmul.mubr.f32.vlgmr.msra.gmra.mrb[34].mxu1 %v3442_v6  ;;  %3645 = vmatmul.mubr.f32.vlgmr.msra.gmra.mrb[40].mxu0 %v3444_v11 }
0x19f5   : > { %5557 = vmatpush3.bf16.msra.mxu1 %v5763_v4  ;;  %4950 = vmatprep.mubr.msk.f32.mxu1 %vm5716_vm0, %v7465_v9 }
0x19f6   : > { %5558 = vmatprep.subr.bf16.mxu1 %v7466_v46  ;;  %5564 = vmatpush1.bf16.msra.mxu0 %v6986_v22 }
0x19f7   : > { %5566 = vmatprep.subr.bf16.mxu0 %v7011_v63  ;;  %3836 = vmatprep.mubr.f32.mxu0 %v7465_v9 }
0x19f9   : > { %5560 = vmatpush3.bf16.msra.mxu1 %v5776_v8 }
0x19fa   : > { %5570 = vmatprep.subr.bf16.mxu1 %v6984_v21  ;;  %5568 = vmatpush1.bf16.msra.mxu0 %v7025_v16 }
0x19fb   : > { %5578 = vmatprep.subr.bf16.mxu0 %v7043_v36  ;;  %v7479_v36 = vld [vmem:[#allocation7_spill] sm:$0xff] }
0x19fc   : > { %4951 = vmatmul.mubr.msk.f32.vlgmr.msra.gmra.mrb[36].mxu1 %vm346_vm2, %v7106_v55 }
0x19fd   : > { %5572 = vmatpush1.bf16.msra.mxu1 %v6998_v30  ;;  %3907 = vmatprep.mubr.f32.mxu1 %v7465_v9 }
0x19fe   : > { %5574 = vmatprep.subr.bf16.mxu1 %v7013_v27 }
0x1a01   : > { %5576 = vmatpush1.bf16.msra.mxu1 %v7032_v49 }
0x1a02   : > { %5610 = vmatprep.subr.bf16.mxu1 %v7051_v50 }
0x1ac7   : > { %v4738_v4 = vpop.f32.mrb[34].mxu1  ;;  %v4773_v8 = vpop.f32.mrb[40].mxu0 }
0x1ac8   : > { %v4739_v46 = vpop.f32.mrb[35].mxu1  ;;  %v4774_v17 = vpop.f32.mrb[41].mxu0 }
0x1ac9   : > { %v4740_v21 = vadd.f32 %v4739_v46, %v4738_v4  ;;  %v4775_v22 = vadd.f32 %v4774_v17, %v4773_v8  ;;  %v7482_v8 = vld [vmem:[#allocation10_spill] sm:$0xff] }
0x1acb   : > { %v3577_v63 = vadd.f32 %v6892_v23, %v4740_v21 }
0x1acd   : > { %v3647_v16 = vadd.f32 %v4775_v22, %v3577_v63 }
0x1acf   : > { %3650 = vst.msk [vmem:[%s6258_s12 + $0x30] sm:$0xff] %vm346_vm2, %v3647_v16  ;;  %v3721_v30 = vpop.f32.mrb[36].mxu1 }
0x1ad0   : > { %v3725_v9 = vadd.f32 %v7479_v36, %v3721_v30  ;;  %v4952_v55 = vpop.f32.mrb[37].mxu1 }
0x1ad2   : > { %v4234_v27 = vmul.f32 -1.442695, %v3725_v9 }
0x1ad4   : > { %5696 = vpow2.f32 %v4234_v27 }
0x1ade   : > { %v5697_v49 = vpop.eup %5696 }
0x1adf   : > { %v3729_v6 = vadd.f32 1.0, %v5697_v49 }
0x1ae1   : > { %5698 = vrcp.f32 %v3729_v6 }
0x1aeb   : > { %v5699_v50 = vpop.eup %5698 }
0x1aec   : > { %v3732_v11 = vmul.f32 2.0, %v5699_v50  ;;  %v3734_v38 = vmul.f32 %v5699_v50, %v6961_v37 }
0x1aee   : > { %v4235_v35 = vadd.f32 -1.0, %v3732_v11 }
0x1af0   : > { %3736 = vrot.lane.b32.xlu0 %v4235_v35, %s5718_s5 }
0x1b62   : > { %v3737_v58 = vpop.permute.xlu0 %3736 }
0x1b63   : > { %v3739_v48 = vmul.f32 %v5699_v50, %v3737_v58 }
0x1b65   : > { %3741 = vrot.lane.b32.xlu1 %v3739_v48, %s5719_s6 }
0x1bd7   : > { %v3742_v26 = vpop.permute.xlu1 %3741 }
0x1bd8   : > { %v3744_v20 = vadd.f32 %v3742_v26, %v3734_v38 }
0x1bda   : > { %5700 = vtanh.f32 %v3744_v20 }
0x1be4   : > { %v5701_v28 = vpop.eup %5700 }
0x1be5   : > { %3747 = vrot.lane.b32.xlu0 %v5701_v28, %s5718_s5 }
0x1be9   : > { %818 = vrot.lane.b32.xlu0 %v7480_v10, %s5718_s5 }
0x1bed   : > { %1763 = vrot.lane.b32.xlu0 %v7481_v59, %s5718_s5 }
0x1bf1   : > { %2707 = vrot.lane.b32.xlu0 %v6805_v57, %s5718_s5  ;;  %v7483_v57 = vld [vmem:[#allocation4_spill] sm:$0xff] }
0x1bf5   : > { %3651 = vrot.lane.b32.xlu0 %v7055_v32, %s5718_s5 }
0x1c57   : > { %v3748_v37 = vpop.permute.xlu0 %3747 }
0x1c58   : > { %v3750_v13 = vmul.f32 %v5699_v50, %v3748_v37 }
0x1c5a   : > { %3768 = vrot.lane.b32.xlu1 %v3750_v13, %s5719_s6 }
0x1c5b   : > { %v819_v4 = vpop.permute.xlu0 %818 }
0x1c5c   : > { %822 = vst.msk [vmem:[%s6258_s12] sm:$0xff] %vm821_vm3, %v819_v4 }
0x1c5e   : > { %1291 = vrot.lane.b32.xlu1 %v7482_v8, %s5718_s5 }
0x1c5f   : > { %v1764_v46 = vpop.permute.xlu0 %1763 }
0x1c60   : > { %1766 = vst.msk [vmem:[%s6258_s12 + $0x10] sm:$0xff] %vm821_vm3, %v1764_v46 }
0x1c62   : > { %2235 = vrot.lane.b32.xlu1 %v7483_v57, %s5718_s5 }
0x1c63   : > { %v2708_v17 = vpop.permute.xlu0 %2707 }
0x1c64   : > { %2710 = vst.msk [vmem:[%s6258_s12 + $0x20] sm:$0xff] %vm821_vm3, %v2708_v17 }
0x1c66   : > { %3179 = vrot.lane.b32.xlu1 %v6905_v41, %s5718_s5 }
0x1c67   : > { %v3652_v32 = vpop.permute.xlu0 %3651 }
0x1c68   : > { %3654 = vst.msk [vmem:[%s6258_s12 + $0x30] sm:$0xff] %vm821_vm3, %v3652_v32 }
0x1c6a   : > { %4123 = vrot.lane.b32.xlu1 %v3750_v13, %s5718_s5 }
0x1ccc   : > { %v3769_v21 = vpop.permute.xlu1 %3768 }
0x1ccd   : > { %4236 = vmatmul.mubr.msk.f32.vlgmr.msra.gmra.mrb[42].mxu0 %vm346_vm2, %v3769_v21  ;;  %4237 = vmatmul.mubr.msk.f32.vlgmr.msra.gmra.mrb[38].mxu1 %vm346_vm2, %v3769_v21 }
0x1cce   : > { %5580 = vmatpush3.bf16.msra.mxu0 %v7083_v15  ;;  %5612 = vmatpush3.bf16.msra.mxu1 %v7085_v19  ;;  %v7484_v19 = vld [vmem:[#allocation6_spill] sm:$0xff] }
0x1ccf   : > { %5582 = vmatprep.subr.bf16.mxu0 %v7093_v43  ;;  %5614 = vmatprep.subr.bf16.mxu1 %v7095_v47  ;;  %v7485_v43 = vld [vmem:[#allocation3_spill] sm:$0xff] }
0x1cd0   : > { %v1292_v41 = vpop.permute.xlu1 %1291 }
0x1cd1   : > { %1294 = vst.msk [vmem:[%s6258_s12 + $0x8] sm:$0xff] %vm821_vm3, %v1292_v41 }
0x1cd2   : > { %5584 = vmatpush3.bf16.msra.mxu0 %v7123_v5  ;;  %5616 = vmatpush3.bf16.msra.mxu1 %v7125_v54 }
0x1cd3   : > { %5586 = vmatprep.subr.bf16.mxu0 %v7135_v44  ;;  %5618 = vmatprep.subr.bf16.mxu1 %v7137_v18 }
0x1cd4   : > { %v2236_v22 = vpop.permute.xlu1 %2235 }
0x1cd5   : > { %2238 = vst.msk [vmem:[%s6258_s12 + $0x18] sm:$0xff] %vm821_vm3, %v2236_v22 }
0x1cd6   : > { %5588 = vmatpush3.bf16.msra.mxu0 %v7159_v52  ;;  %5620 = vmatpush3.bf16.msra.mxu1 %v7161_v1 }
0x1cd7   : > { %5590 = vmatprep.subr.bf16.mxu0 %v7171_v25  ;;  %5622 = vmatprep.subr.bf16.mxu1 %v7173_v53 }
0x1cd8   : > { %v3180_v15 = vpop.permute.xlu1 %3179 }
0x1cd9   : > { %3182 = vst.msk [vmem:[%s6258_s12 + $0x28] sm:$0xff] %vm821_vm3, %v3180_v15 }
0x1cda   : > { %5592 = vmatpush3.bf16.msra.mxu0 %v7195_v33  ;;  %5624 = vmatpush3.bf16.msra.mxu1 %v7197_v24 }
0x1cdb   : > { %5594 = vmatprep.subr.bf16.mxu0 %v7207_v60  ;;  %5626 = vmatprep.subr.bf16.mxu1 %v7209_v12 }
0x1cde   : > { %5596 = vmatpush3.bf16.msra.mxu0 %v7231_v42  ;;  %5628 = vmatpush3.bf16.msra.mxu1 %v7233_v51 }
0x1cdf   : > { %5598 = vmatprep.subr.bf16.mxu0 %v7243_v34  ;;  %5630 = vmatprep.subr.bf16.mxu1 %v7245_v7 }
0x1ce2   : > { %5600 = vmatpush3.bf16.msra.mxu0 %v7267_v45  ;;  %5632 = vmatpush3.bf16.msra.mxu1 %v7269_v56 }
0x1ce3   : > { %5602 = vmatprep.subr.bf16.mxu0 %v7273_v3  ;;  %5634 = vmatprep.subr.bf16.mxu1 %v7281_v40 }
0x1ce6   : > { %5604 = vmatpush3.bf16.msra.mxu0 %v7285_v14  ;;  %5636 = vmatpush3.bf16.msra.mxu1 %v7296_v31 }
0x1ce7   : > { %5606 = vmatprep.subr.bf16.mxu0 %v7305_v29  ;;  %5638 = vmatprep.subr.bf16.mxu1 %v7484_v19 }
0x1cea   : > { %5608 = vmatpush3.bf16.msra.mxu0 %v7485_v43  ;;  %5640 = vmatpush3.bf16.msra.mxu1 %v7330_v39 }
0x1da0   : > { %v3838_v47 = vpop.f32.mrb[42].mxu0  ;;  %v3909_v5 = vpop.f32.mrb[38].mxu1 }
0x1da1   : > { %v3839_v54 = vadd.f32 %v6850_v2, %v3838_v47  ;;  %v3910_v44 = vadd.f32 %v6856_v62, %v3909_v5  ;;  %v3840_v18 = vpop.f32.mrb[43].mxu0  ;;  %v3911_v52 = vpop.f32.mrb[39].mxu1 }
0x1da2   : > { %v3841_v1 = vadd.f32 %v6862_v0, %v3840_v18  ;;  %v3912_v25 = vadd.f32 %v6868_v61, %v3911_v52  ;;  %v4124_v61 = vpop.permute.xlu1 %4123 }
0x1da3   : > { %v3914_v24 = vmax.f32 %v3839_v54, 0.0  ;;  %v3916_v60 = vmax.f32 %v3910_v44, 0.0 }
0x1da4   : > { %v3915_v53 = vmax.f32 %v3841_v1, 0.0  ;;  %v3917_v33 = vmax.f32 %v3912_v25, 0.0 }
0x1da6   : > { %4046 = vmatprep.mubr.f32.mxu0 %v3915_v53  ;;  %4116 = vmatprep.mubr.f32.mxu1 %v3917_v33 }
0x1da7   : > { %4047 = vmatmul.mubr.f32.vlgmr.msra.gmra.mrb[44].mxu0 %v3914_v24  ;;  %4117 = vmatmul.mubr.f32.vlgmr.msra.gmra.mrb[40].mxu1 %v3916_v60 }
0x1e7a   : > { %v4813_v12 = vpop.f32.mrb[44].mxu0  ;;  %v4848_v2 = vpop.f32.mrb[40].mxu1 }
0x1e7b   : > { %v4814_v42 = vpop.f32.mrb[45].mxu0  ;;  %v4849_v62 = vpop.f32.mrb[41].mxu1 }
0x1e7c   : > { %v4815_v51 = vadd.f32 %v4814_v42, %v4813_v12  ;;  %v4850_v34 = vadd.f32 %v4849_v62, %v4848_v2 }
0x1e7e   : > { %v4049_v0 = vadd.f32 %v6892_v23, %v4815_v51 }
0x1e80   : > { %v4119_v7 = vadd.f32 %v4850_v34, %v4049_v0 }
0x1e82   : > { %4122 = vst.msk [vmem:[%s6258_s12 + $0x38] sm:$0xff] %vm346_vm2, %v4119_v7 }
0x1e83   : > { %4126 = vst.msk [vmem:[%s6258_s12 + $0x38] sm:$0xff] %vm821_vm3, %v4124_v61 }
0x1e84 PF: > { %s14_s15 = sadd.s32 1, %s5713_s15  }
0x1e85   : > { %p11_p4 = scmp.ge.s32.totalorder %s14_s15, 6  }
0x1e87   :  { %13 = sbr.rel (!%p11_p4) target bundleno = 1 (0x1), region = 66 }

</bundles_post_ra>
